<compile_context>
chip_gen: v5e
topology: v5e:2x2
jax: 0.10.0
libtpu: 0.0.40
codegen_flags: <defaults>
</compile_context>

<pallas_src>
import functools

import jax
import jax.numpy as jnp
import numpy as np
from jax import lax
from jax.experimental import pallas as pl
from jax.experimental.pallas import tpu as pltpu


VMEM_LIMIT_BYTES = 32 * 1024 * 1024   # safe on v5e/v6e (128 MiB) and v7x (64 MiB)


def _tpu_defaults():
    """Per-generation tiling defaults: (row tile, VMEM working budget bytes)."""
    tn = 256                       # matches v6e/v7x 256-wide MXU
    vmem_budget = 16 << 20         # conservative fallback
    try:
        info = pltpu.get_tpu_info()
        name = str(getattr(info, "chip_version", "")) + str(getattr(info, "version", ""))
        if "5" in name:            # v5e/v5p: 128-wide MXU
            tn = 128
        cap = getattr(info, "vmem_capacity_bytes", None)
        if cap:
            vmem_budget = int(min(cap // 4, 24 << 20))
    except Exception:
        pass
    return tn, vmem_budget


def _fast_sigmoid(x):
    # sigmoid(x) == 0.5 * tanh(0.5 * x) + 0.5  -> one EUP op instead of exp+recip.
    return 0.5 * jnp.tanh(0.5 * x) + 0.5


# ----------------------- Tiled matmul + bias kernel (final FC) -----------------------
def _matmul_bias_kernel(x_ref, w_ref, b_ref, o_ref):
    o_ref[...] = (jnp.dot(x_ref[...], w_ref[...],
                          preferred_element_type=jnp.float32)
                  + b_ref[...]).astype(o_ref.dtype)


def matmul_bias_pallas(x, w, b, *, tn=None, tv=512, vmem_budget=None):
    """(N, K) @ (K, V) + (1, V) -> (N, V) float32.

    Grid = (vocab tiles, row tiles) with the ROW axis innermost so the (K, tv)
    weight slab's block index is constant over it -> weight stays VMEM-resident
    and total FC weight HBM traffic is H*V once (the small activation matrix is
    what gets re-streamed).
    """
    N, K = x.shape
    V = w.shape[-1]
    def_tn, def_budget = _tpu_defaults()
    if tn is None:
        tn = def_tn
    if vmem_budget is None:
        vmem_budget = def_budget
    tn = min(tn, N)
    tv = min(tv, V)

    itemsize = jnp.dtype(x.dtype).itemsize
    def _need(_tn, _tv):
        return 2 * (_tn * K + K * _tv + _tv) * itemsize + 2 * _tn * _tv * 4
    while _need(tn, tv) > vmem_budget and tv > 128:
        tv //= 2
    while _need(tn, tv) > vmem_budget and tn > 8:
        tn //= 2

    grid = (pl.cdiv(V, tv), pl.cdiv(N, tn))   # vocab outer, rows inner
    return pl.pallas_call(
        _matmul_bias_kernel,
        out_shape=jax.ShapeDtypeStruct((N, V), jnp.float32),
        grid_spec=pltpu.PrefetchScalarGridSpec(
            num_scalar_prefetch=0,
            grid=grid,
            in_specs=[
                pl.BlockSpec((tn, K), lambda j, i: (i, 0)),   # activations (re-streamed)
                pl.BlockSpec((K, tv), lambda j, i: (0, j)),   # weight slab (resident over i)
                pl.BlockSpec((1, tv), lambda j, i: (0, j)),   # bias slab
            ],
            out_specs=pl.BlockSpec((tn, tv), lambda j, i: (i, j))),
        compiler_params=pltpu.CompilerParams(
            dimension_semantics=("parallel", "parallel"),
            vmem_limit_bytes=VMEM_LIMIT_BYTES),
    )(x, w, b)


# --------------------- Fused (GX + recurrence) time-chunked LSTM ---------------------
def _lstm_chunk_kernel(x_ref, wih_ref, whh_ref, b_ref, h0_ref, c0_ref,
                       y_ref, hN_ref, cN_ref, gx_sc, h_sc, c_sc,
                       *, tc, hidden_dim, compute_dtype):
    """One grid step = `tc` timesteps.

    The input projection GX = X @ W_ih^T + bias for the whole chunk is computed
    here (one MXU matmul) into VMEM scratch, so no pre-activation tensor ever
    round-trips through HBM.  Only h @ W_hh^T remains inside the per-step loop.
    h/c are carried across chunks in VMEM scratch.
    """
    H = hidden_dim
    B = h0_ref.shape[0]
    E = x_ref.shape[-1]

    @pl.when(pl.program_id(0) == 0)
    def _():
        h_sc[...] = h0_ref[...]
        c_sc[...] = c0_ref[...]

    # Hoisted per-chunk input projection: (tc*B, E) @ (E, 4H) on the MXU.
    x2 = x_ref[...].reshape(tc * B, E)
    gx2 = jnp.dot(x2, wih_ref[...], preferred_element_type=jnp.float32) + b_ref[...]
    gx_sc[...] = gx2.reshape(tc, B, 4 * H)

    whh = whh_ref[...]   # (H, 4H) resident (constant block index)

    def step(s, carry):
        h, c = carry
        gates = gx_sc[s] + jnp.dot(h.astype(compute_dtype), whh,
                                   preferred_element_type=jnp.float32)   # (B, 4H) f32
        i_g = _fast_sigmoid(gates[:, 0 * H:1 * H])
        f_g = _fast_sigmoid(gates[:, 1 * H:2 * H])
        g_g = jnp.tanh(gates[:, 2 * H:3 * H])
        o_g = _fast_sigmoid(gates[:, 3 * H:4 * H])
        c = f_g * c + i_g * g_g
        h = o_g * jnp.tanh(c)
        y_ref[s] = h.astype(y_ref.dtype)   # stays in the VMEM output block
        return h, c

    h, c = lax.fori_loop(0, tc, step, (h_sc[...], c_sc[...]),
                         unroll=min(tc, 8))

    h_sc[...] = h
    c_sc[...] = c
    # Write final-state outputs every chunk (block index constant -> single HBM
    # writeback); avoids relying on deferred writeback of a last-chunk-only store.
    hN_ref[...] = h
    cN_ref[...] = c


def lstm_layer_pallas(x_tbe, wih_t, whh_t, bias, h0, c0,
                      *, hidden_dim, chunk, compute_dtype, out_dtype):
    """One LSTM layer, time-major in (T,B,E) / out (T,B,H)."""
    T, B, E = x_tbe.shape
    H = hidden_dim
    assert T % chunk == 0
    n_chunks = T // chunk
    kernel = functools.partial(_lstm_chunk_kernel, tc=chunk, hidden_dim=H,
                               compute_dtype=compute_dtype)
    return pl.pallas_call(
        kernel,
        out_shape=(jax.ShapeDtypeStruct((T, B, H), out_dtype),
                   jax.ShapeDtypeStruct((B, H), jnp.float32),
                   jax.ShapeDtypeStruct((B, H), jnp.float32)),
        grid_spec=pltpu.PrefetchScalarGridSpec(
            num_scalar_prefetch=0,
            grid=(n_chunks,),
            in_specs=[
                pl.BlockSpec((chunk, B, E), lambda t: (t, 0, 0)),   # X chunk (streamed)
                pl.BlockSpec((E, 4 * H), lambda t: (0, 0)),         # W_ih^T (invariant)
                pl.BlockSpec((H, 4 * H), lambda t: (0, 0)),         # W_hh^T (invariant)
                pl.BlockSpec((1, 4 * H), lambda t: (0, 0)),         # b_ih + b_hh
                pl.BlockSpec((B, H), lambda t: (0, 0)),             # h0
                pl.BlockSpec((B, H), lambda t: (0, 0)),             # c0
            ],
            out_specs=[
                pl.BlockSpec((chunk, B, H), lambda t: (t, 0, 0)),   # y chunk
                pl.BlockSpec((B, H), lambda t: (0, 0)),             # h_N
                pl.BlockSpec((B, H), lambda t: (0, 0)),             # c_N
            ],
            scratch_shapes=[pltpu.VMEM((chunk, B, 4 * H), jnp.float32),  # GX chunk
                            pltpu.VMEM((B, H), jnp.float32),             # h carry
                            pltpu.VMEM((B, H), jnp.float32)]),           # c carry
        compiler_params=pltpu.CompilerParams(
            dimension_semantics=("arbitrary",),    # sequential recurrence
            vmem_limit_bytes=VMEM_LIMIT_BYTES),
    )(x_tbe.astype(compute_dtype), wih_t.astype(compute_dtype),
      whh_t.astype(compute_dtype), bias, h0, c0)


def _pick_time_chunk(T, B, E, H, in_bytes, out_bytes, budget_bytes, max_chunk=64):
    """Largest divisor of T whose VMEM footprint fits the budget.

    Per chunk: 2 bufs x (chunk*B*E) input + 2 bufs x (chunk*B*H) output
               + chunk*B*4H f32 GX scratch; plus (double-buffered) weights and
               f32 h/c state.
    """
    per_step = B * (2 * E * in_bytes + 2 * H * out_bytes + 4 * H * 4)
    fixed = 2 * (E + H) * 4 * H * in_bytes + 4 * B * H * 4 + 2 * 4 * H * 4
    avail = max(budget_bytes - fixed, per_step)
    cap = int(max(1, min(T, max_chunk, avail // per_step)))
    tc = 1
    for d in range(1, cap + 1):
        if T % d == 0:
            tc = d
    return tc


# --------------------------------- Full forward pass ---------------------------------
def decoder_lstm_forward(params, input_ids, hidden, cell,
                         compute_dtype=jnp.bfloat16):
    """Mirrors DecoderLSTM.forward.

    input_ids: (B, T) int32; hidden, cell: (L, B, H) float32.
    Returns (predictions (B, T, V), hidden (L, B, H), cell (L, B, H)).
    """
    _, vmem_budget = _tpu_defaults()
    in_bytes = jnp.dtype(compute_dtype).itemsize

    # Embedding gather directly in time-major order (transpose the tiny int id
    # matrix, never the activations).
    x = params["embedding"][input_ids.T].astype(compute_dtype)       # (T, B, E)
    T, B, _ = x.shape
    H = hidden.shape[-1]

    h_out, c_out = [], []
    for l, lp in enumerate(params["lstm"]):
        E_in = x.shape[-1]
        chunk = _pick_time_chunk(T, B, E_in, H, in_bytes, in_bytes, vmem_budget)
        x, hN, cN = lstm_layer_pallas(
            x, lp["wih_t"], lp["whh_t"], lp["bias"], hidden[l], cell[l],
            hidden_dim=H, chunk=chunk, compute_dtype=compute_dtype,
            out_dtype=compute_dtype)                                  # (T, B, H)
        h_out.append(hN)
        c_out.append(cN)

    # Final Linear: transpose the (small, H-wide, compute_dtype) activations once.
    # TODO(synk): fold this reorder into the FC input index_map to avoid the
    #             standalone HBM pass.
    y_bt = jnp.transpose(x, (1, 0, 2)).reshape(B * T, H)
    preds = matmul_bias_pallas(
        y_bt, params["fc_w_t"].astype(compute_dtype), params["fc_b"],
        vmem_budget=vmem_budget)                                      # (B*T, V) f32
    V = preds.shape[-1]
    return preds.reshape(B, T, V), jnp.stack(h_out, 0), jnp.stack(c_out, 0)


# --------------------------------- Pure-JAX reference ---------------------------------
def decoder_lstm_reference(params, input_ids, hidden, cell,
                           compute_dtype=jnp.float32):
    """Same math / dtype policy as the Pallas path, written in plain JAX."""
    x = params["embedding"][input_ids.T].astype(jnp.float32)        # (T, B, E)
    T, B, _ = x.shape
    H = hidden.shape[-1]
    h_out, c_out = [], []
    for l, lp in enumerate(params["lstm"]):
        gx = (jnp.dot(x.reshape(T * B, -1).astype(compute_dtype),
                      lp["wih_t"].astype(compute_dtype),
                      preferred_element_type=jnp.float32)
              + lp["bias"]).reshape(T, B, 4 * H)
        h, c = hidden[l], cell[l]
        ys = []
        for t in range(T):
            gates = gx[t] + jnp.dot(h.astype(compute_dtype),
                                    lp["whh_t"].astype(compute_dtype),
                                    preferred_element_type=jnp.float32)
            i = jax.nn.sigmoid(gates[:, 0 * H:1 * H])
            f = jax.nn.sigmoid(gates[:, 1 * H:2 * H])
            g = jnp.tanh(gates[:, 2 * H:3 * H])
            o = jax.nn.sigmoid(gates[:, 3 * H:4 * H])
            c = f * c + i * g
            h = o * jnp.tanh(c)
            ys.append(h)
        x = jnp.stack(ys, 0)
        h_out.append(h)
        c_out.append(c)
    y = jnp.transpose(x, (1, 0, 2)).reshape(B * T, H)
    preds = (jnp.dot(y.astype(compute_dtype),
                     params["fc_w_t"].astype(compute_dtype),
                     preferred_element_type=jnp.float32)
             + params["fc_b"]).reshape(B, T, -1)
    return preds, jnp.stack(h_out, 0), jnp.stack(c_out, 0)


# ------------------------------------- Param init -------------------------------------
def init_params(key, vocab_size, embedding_dim, hidden_dim, num_layers):
    keys = jax.random.split(key, 3 + 4 * num_layers)
    k = 1.0 / np.sqrt(hidden_dim)
    params = {
        "embedding": jax.random.normal(
            keys[0], (vocab_size, embedding_dim), jnp.float32) * 0.1,
        "fc_w_t": jax.random.uniform(
            keys[1], (hidden_dim, vocab_size), jnp.float32, -k, k),
        "fc_b": jax.random.uniform(
            keys[2], (1, vocab_size), jnp.float32, -k, k),
        "lstm": [],
    }
    for l in range(num_layers):
        in_dim = embedding_dim if l == 0 else hidden_dim
        kw = keys[3 + 4 * l: 3 + 4 * (l + 1)]
        wih_t = jax.random.uniform(kw[0], (in_dim, 4 * hidden_dim),
                                   jnp.float32, -k, k)     # W_ih^T
        whh_t = jax.random.uniform(kw[1], (hidden_dim, 4 * hidden_dim),
                                   jnp.float32, -k, k)     # W_hh^T
        b_ih = jax.random.uniform(kw[2], (4 * hidden_dim,), jnp.float32, -k, k)
        b_hh = jax.random.uniform(kw[3], (4 * hidden_dim,), jnp.float32, -k, k)
        params["lstm"].append({
            "wih_t": wih_t,
            "whh_t": whh_t,
            "bias": (b_ih + b_hh).reshape(1, 4 * hidden_dim),
        })
    return params


if __name__ == "__main__":
    vocab_size, embedding_dim, hidden_dim, num_layers = 64, 32, 32, 2
    B, T = 2, 8

    key = jax.random.PRNGKey(0)
    k_par, k_ids, k_h, k_c = jax.random.split(key, 4)

    params = init_params(k_par, vocab_size, embedding_dim, hidden_dim, num_layers)
    input_ids = jax.random.randint(k_ids, (B, T), 0, vocab_size, jnp.int32)
    hidden = jax.random.normal(k_h, (num_layers, B, hidden_dim), jnp.float32) * 0.1
    cell = jax.random.normal(k_c, (num_layers, B, hidden_dim), jnp.float32) * 0.1

    # --- float32 path: tight check of forward-pass semantics vs the reference ---
    preds32, h32, c32 = jax.block_until_ready(
        decoder_lstm_forward(params, input_ids, hidden, cell,
                             compute_dtype=jnp.float32))
    pr32, hr32, cr32 = decoder_lstm_reference(params, input_ids, hidden, cell,
                                              compute_dtype=jnp.float32)
    np.testing.assert_allclose(np.asarray(preds32), np.asarray(pr32),
                               rtol=5e-4, atol=5e-4)
    np.testing.assert_allclose(np.asarray(h32), np.asarray(hr32),
                               rtol=5e-4, atol=5e-4)
    np.testing.assert_allclose(np.asarray(c32), np.asarray(cr32),
                               rtol=5e-4, atol=5e-4)

    # --- bf16 fast path (bf16 MXU inputs + bf16 inter-layer y, f32 accumulation/state) ---
    preds_bf, h_bf, c_bf = jax.block_until_ready(
        decoder_lstm_forward(params, input_ids, hidden, cell,
                             compute_dtype=jnp.bfloat16))
    pr_bf, hr_bf, cr_bf = decoder_lstm_reference(params, input_ids, hidden, cell,
                                                 compute_dtype=jnp.bfloat16)
    np.testing.assert_allclose(np.asarray(preds_bf), np.asarray(pr_bf),
                               rtol=2e-2, atol=2e-2)
    np.testing.assert_allclose(np.asarray(h_bf), np.asarray(hr_bf),
                               rtol=2e-2, atol=2e-2)
    np.testing.assert_allclose(np.asarray(c_bf), np.asarray(cr_bf),
                               rtol=2e-2, atol=2e-2)

    assert preds32.shape == (B, T, vocab_size)
    assert h32.shape == (num_layers, B, hidden_dim)
    assert c32.shape == (num_layers, B, hidden_dim)
    print("KERNEL_OK")
</pallas_src>

<mosaic_0001>
module attributes {stable_mosaic.version = 11 : i64} {
  func.func @_lstm_chunk_kernel(%arg0: i32, %arg1: memref<8x2x32xf32, #tpu.memory_space<vmem>>, %arg2: memref<32x128xf32, #tpu.memory_space<vmem>>, %arg3: memref<32x128xf32, #tpu.memory_space<vmem>>, %arg4: memref<1x128xf32, #tpu.memory_space<vmem>>, %arg5: memref<2x32xf32, #tpu.memory_space<vmem>>, %arg6: memref<2x32xf32, #tpu.memory_space<vmem>>, %arg7: memref<8x2x32xf32, #tpu.memory_space<vmem>>, %arg8: memref<2x32xf32, #tpu.memory_space<vmem>>, %arg9: memref<2x32xf32, #tpu.memory_space<vmem>>, %arg10: memref<8x2x128xf32, #tpu.memory_space<vmem>>, %arg11: memref<2x32xf32, #tpu.memory_space<vmem>>, %arg12: memref<2x32xf32, #tpu.memory_space<vmem>>) attributes {dimension_semantics = [#tpu.dimension_semantics<arbitrary>], iteration_bounds = array<i64: 1>, scalar_prefetch = 0 : i64, scratch_operands = 3 : i64, tpu.core_type = #tpu.core_type<tc>, window_params = [{transform_indices = @transform_0, window_bounds = array<i64: 8, 2, 32>}, {pipeline_mode = #tpu.pipeline_mode<synchronous>, transform_indices = @transform_1, window_bounds = array<i64: 32, 128>}, {pipeline_mode = #tpu.pipeline_mode<synchronous>, transform_indices = @transform_2, window_bounds = array<i64: 32, 128>}, {pipeline_mode = #tpu.pipeline_mode<synchronous>, transform_indices = @transform_3, window_bounds = array<i64: 1, 128>}, {pipeline_mode = #tpu.pipeline_mode<synchronous>, transform_indices = @transform_4, window_bounds = array<i64: 2, 32>}, {pipeline_mode = #tpu.pipeline_mode<synchronous>, transform_indices = @transform_5, window_bounds = array<i64: 2, 32>}, {transform_indices = @transform_6, window_bounds = array<i64: 8, 2, 32>}, {pipeline_mode = #tpu.pipeline_mode<synchronous>, transform_indices = @transform_7, window_bounds = array<i64: 2, 32>}, {pipeline_mode = #tpu.pipeline_mode<synchronous>, transform_indices = @transform_8, window_bounds = array<i64: 2, 32>}]} {
    %c0_i32 = arith.constant 0 : i32
    %0 = arith.cmpi eq, %arg0, %c0_i32 : i32
    %1 = arith.extui %0 : i1 to i32
    %c0_i32_0 = arith.constant 0 : i32
    %2 = arith.cmpi ne, %1, %c0_i32_0 : i32
    scf.if %2 {
      %c0_137 = arith.constant 0 : index
      %c0_138 = arith.constant 0 : index
      %339 = vector.load %arg5[%c0_137, %c0_138] : memref<2x32xf32, #tpu.memory_space<vmem>>, vector<2x32xf32>
      %c0_139 = arith.constant 0 : index
      %c0_140 = arith.constant 0 : index
      %340 = vector.load %arg11[%c0_139, %c0_140] : memref<2x32xf32, #tpu.memory_space<vmem>>, vector<2x32xf32>
      tpu.vector_store %arg11[%c0_139, %c0_140], %339 {strides = array<i32>} : memref<2x32xf32, #tpu.memory_space<vmem>>, vector<2x32xf32>,
      %c0_141 = arith.constant 0 : index
      %c0_142 = arith.constant 0 : index
      %341 = vector.load %arg6[%c0_141, %c0_142] : memref<2x32xf32, #tpu.memory_space<vmem>>, vector<2x32xf32>
      %c0_143 = arith.constant 0 : index
      %c0_144 = arith.constant 0 : index
      %342 = vector.load %arg12[%c0_143, %c0_144] : memref<2x32xf32, #tpu.memory_space<vmem>>, vector<2x32xf32>
      tpu.vector_store %arg12[%c0_143, %c0_144], %341 {strides = array<i32>} : memref<2x32xf32, #tpu.memory_space<vmem>>, vector<2x32xf32>,
    } else {
    }
    %c0 = arith.constant 0 : index
    %c0_1 = arith.constant 0 : index
    %c0_2 = arith.constant 0 : index
    %3 = vector.load %arg1[%c0, %c0_1, %c0_2] : memref<8x2x32xf32, #tpu.memory_space<vmem>>, vector<8x2x32xf32>
    %4 = vector.shape_cast %3 : vector<8x2x32xf32> to vector<16x32xf32>
    %c0_3 = arith.constant 0 : index
    %c0_4 = arith.constant 0 : index
    %5 = vector.load %arg2[%c0_3, %c0_4] : memref<32x128xf32, #tpu.memory_space<vmem>>, vector<32x128xf32>
    %cst = arith.constant dense<0.000000e+00> : vector<16x128xf32>
    %6 = tpu.matmul %4, %5, %cst {dimension_numbers = #tpu.dot_dimension_numbers<[1], [0], [0], [1], [0, 0, 1, 1], [], []>} : vector<16x32xf32>, vector<32x128xf32>, vector<16x128xf32> -> vector<16x128xf32>
    %c0_5 = arith.constant 0 : index
    %c0_6 = arith.constant 0 : index
    %7 = vector.load %arg4[%c0_5, %c0_6] : memref<1x128xf32, #tpu.memory_space<vmem>>, vector<1x128xf32>
    %8 = vector.broadcast %7 : vector<1x128xf32> to vector<16x128xf32>
    %9 = arith.addf %6, %8 : vector<16x128xf32>
    %10 = vector.shape_cast %9 : vector<16x128xf32> to vector<8x2x128xf32>
    %c0_7 = arith.constant 0 : index
    %c0_8 = arith.constant 0 : index
    %c0_9 = arith.constant 0 : index
    %11 = vector.load %arg10[%c0_7, %c0_8, %c0_9] : memref<8x2x128xf32, #tpu.memory_space<vmem>>, vector<8x2x128xf32>
    tpu.vector_store %arg10[%c0_7, %c0_8, %c0_9], %10 {strides = array<i32>} : memref<8x2x128xf32, #tpu.memory_space<vmem>>, vector<8x2x128xf32>,
    %c0_10 = arith.constant 0 : index
    %c0_11 = arith.constant 0 : index
    %12 = vector.load %arg3[%c0_10, %c0_11] : memref<32x128xf32, #tpu.memory_space<vmem>>, vector<32x128xf32>
    %c0_12 = arith.constant 0 : index
    %c0_13 = arith.constant 0 : index
    %13 = vector.load %arg11[%c0_12, %c0_13] : memref<2x32xf32, #tpu.memory_space<vmem>>, vector<2x32xf32>
    %c0_14 = arith.constant 0 : index
    %c0_15 = arith.constant 0 : index
    %14 = vector.load %arg12[%c0_14, %c0_15] : memref<2x32xf32, #tpu.memory_space<vmem>>, vector<2x32xf32>
    %c0_i32_16 = arith.constant 0 : i32
    %15 = arith.index_cast %c0_i32_16 : i32 to index
    %c0_17 = arith.constant 0 : index
    %c0_18 = arith.constant 0 : index
    %16 = vector.load %arg10[%15, %c0_17, %c0_18] : memref<8x2x128xf32, #tpu.memory_space<vmem>>, vector<1x2x128xf32>
    %17 = vector.shape_cast %16 : vector<1x2x128xf32> to vector<2x128xf32>
    %cst_19 = arith.constant dense<0.000000e+00> : vector<2x128xf32>
    %18 = tpu.matmul %13, %12, %cst_19 {dimension_numbers = #tpu.dot_dimension_numbers<[1], [0], [0], [1], [0, 0, 1, 1], [], []>} : vector<2x32xf32>, vector<32x128xf32>, vector<2x128xf32> -> vector<2x128xf32>
    %19 = arith.addf %17, %18 : vector<2x128xf32>
    %20 = vector.extract_strided_slice %19 {offsets = [0, 0], sizes = [2, 32], strides = [1, 1]} : vector<2x128xf32> to vector<2x32xf32>
    %cst_20 = arith.constant 5.000000e-01 : f32
    %21 = vector.broadcast %cst_20 : f32 to vector<2x32xf32>
    %22 = arith.mulf %21, %20 : vector<2x32xf32>
    %23 = math.tanh %22 : vector<2x32xf32>
    %cst_21 = arith.constant 5.000000e-01 : f32
    %24 = vector.broadcast %cst_21 : f32 to vector<2x32xf32>
    %25 = arith.mulf %24, %23 : vector<2x32xf32>
    %cst_22 = arith.constant 5.000000e-01 : f32
    %26 = vector.broadcast %cst_22 : f32 to vector<2x32xf32>
    %27 = arith.addf %25, %26 : vector<2x32xf32>
    %28 = vector.extract_strided_slice %19 {offsets = [0, 32], sizes = [2, 32], strides = [1, 1]} : vector<2x128xf32> to vector<2x32xf32>
    %cst_23 = arith.constant 5.000000e-01 : f32
    %29 = vector.broadcast %cst_23 : f32 to vector<2x32xf32>
    %30 = arith.mulf %29, %28 : vector<2x32xf32>
    %31 = math.tanh %30 : vector<2x32xf32>
    %cst_24 = arith.constant 5.000000e-01 : f32
    %32 = vector.broadcast %cst_24 : f32 to vector<2x32xf32>
    %33 = arith.mulf %32, %31 : vector<2x32xf32>
    %cst_25 = arith.constant 5.000000e-01 : f32
    %34 = vector.broadcast %cst_25 : f32 to vector<2x32xf32>
    %35 = arith.addf %33, %34 : vector<2x32xf32>
    %36 = vector.extract_strided_slice %19 {offsets = [0, 64], sizes = [2, 32], strides = [1, 1]} : vector<2x128xf32> to vector<2x32xf32>
    %37 = math.tanh %36 : vector<2x32xf32>
    %38 = vector.extract_strided_slice %19 {offsets = [0, 96], sizes = [2, 32], strides = [1, 1]} : vector<2x128xf32> to vector<2x32xf32>
    %cst_26 = arith.constant 5.000000e-01 : f32
    %39 = vector.broadcast %cst_26 : f32 to vector<2x32xf32>
    %40 = arith.mulf %39, %38 : vector<2x32xf32>
    %41 = math.tanh %40 : vector<2x32xf32>
    %cst_27 = arith.constant 5.000000e-01 : f32
    %42 = vector.broadcast %cst_27 : f32 to vector<2x32xf32>
    %43 = arith.mulf %42, %41 : vector<2x32xf32>
    %cst_28 = arith.constant 5.000000e-01 : f32
    %44 = vector.broadcast %cst_28 : f32 to vector<2x32xf32>
    %45 = arith.addf %43, %44 : vector<2x32xf32>
    %46 = arith.mulf %35, %14 : vector<2x32xf32>
    %47 = arith.mulf %27, %37 : vector<2x32xf32>
    %48 = arith.addf %46, %47 : vector<2x32xf32>
    %49 = math.tanh %48 : vector<2x32xf32>
    %50 = arith.mulf %45, %49 : vector<2x32xf32>
    %51 = arith.index_cast %c0_i32_16 : i32 to index
    %c0_29 = arith.constant 0 : index
    %c0_30 = arith.constant 0 : index
    %52 = vector.load %arg7[%51, %c0_29, %c0_30] : memref<8x2x32xf32, #tpu.memory_space<vmem>>, vector<1x2x32xf32>
    %53 = vector.shape_cast %52 : vector<1x2x32xf32> to vector<2x32xf32>
    %54 = vector.shape_cast %50 : vector<2x32xf32> to vector<1x2x32xf32>
    tpu.vector_store %arg7[%51, %c0_29, %c0_30], %54 {strides = array<i32>} : memref<8x2x32xf32, #tpu.memory_space<vmem>>, vector<1x2x32xf32>,
    %c1_i32 = arith.constant 1 : i32
    %55 = arith.index_cast %c1_i32 : i32 to index
    %c0_31 = arith.constant 0 : index
    %c0_32 = arith.constant 0 : index
    %56 = vector.load %arg10[%55, %c0_31, %c0_32] : memref<8x2x128xf32, #tpu.memory_space<vmem>>, vector<1x2x128xf32>
    %57 = vector.shape_cast %56 : vector<1x2x128xf32> to vector<2x128xf32>
    %cst_33 = arith.constant dense<0.000000e+00> : vector<2x128xf32>
    %58 = tpu.matmul %50, %12, %cst_33 {dimension_numbers = #tpu.dot_dimension_numbers<[1], [0], [0], [1], [0, 0, 1, 1], [], []>} : vector<2x32xf32>, vector<32x128xf32>, vector<2x128xf32> -> vector<2x128xf32>
    %59 = arith.addf %57, %58 : vector<2x128xf32>
    %60 = vector.extract_strided_slice %59 {offsets = [0, 0], sizes = [2, 32], strides = [1, 1]} : vector<2x128xf32> to vector<2x32xf32>
    %cst_34 = arith.constant 5.000000e-01 : f32
    %61 = vector.broadcast %cst_34 : f32 to vector<2x32xf32>
    %62 = arith.mulf %61, %60 : vector<2x32xf32>
    %63 = math.tanh %62 : vector<2x32xf32>
    %cst_35 = arith.constant 5.000000e-01 : f32
    %64 = vector.broadcast %cst_35 : f32 to vector<2x32xf32>
    %65 = arith.mulf %64, %63 : vector<2x32xf32>
    %cst_36 = arith.constant 5.000000e-01 : f32
    %66 = vector.broadcast %cst_36 : f32 to vector<2x32xf32>
    %67 = arith.addf %65, %66 : vector<2x32xf32>
    %68 = vector.extract_strided_slice %59 {offsets = [0, 32], sizes = [2, 32], strides = [1, 1]} : vector<2x128xf32> to vector<2x32xf32>
    %cst_37 = arith.constant 5.000000e-01 : f32
    %69 = vector.broadcast %cst_37 : f32 to vector<2x32xf32>
    %70 = arith.mulf %69, %68 : vector<2x32xf32>
    %71 = math.tanh %70 : vector<2x32xf32>
    %cst_38 = arith.constant 5.000000e-01 : f32
    %72 = vector.broadcast %cst_38 : f32 to vector<2x32xf32>
    %73 = arith.mulf %72, %71 : vector<2x32xf32>
    %cst_39 = arith.constant 5.000000e-01 : f32
    %74 = vector.broadcast %cst_39 : f32 to vector<2x32xf32>
    %75 = arith.addf %73, %74 : vector<2x32xf32>
    %76 = vector.extract_strided_slice %59 {offsets = [0, 64], sizes = [2, 32], strides = [1, 1]} : vector<2x128xf32> to vector<2x32xf32>
    %77 = math.tanh %76 : vector<2x32xf32>
    %78 = vector.extract_strided_slice %59 {offsets = [0, 96], sizes = [2, 32], strides = [1, 1]} : vector<2x128xf32> to vector<2x32xf32>
    %cst_40 = arith.constant 5.000000e-01 : f32
    %79 = vector.broadcast %cst_40 : f32 to vector<2x32xf32>
    %80 = arith.mulf %79, %78 : vector<2x32xf32>
    %81 = math.tanh %80 : vector<2x32xf32>
    %cst_41 = arith.constant 5.000000e-01 : f32
    %82 = vector.broadcast %cst_41 : f32 to vector<2x32xf32>
    %83 = arith.mulf %82, %81 : vector<2x32xf32>
    %cst_42 = arith.constant 5.000000e-01 : f32
    %84 = vector.broadcast %cst_42 : f32 to vector<2x32xf32>
    %85 = arith.addf %83, %84 : vector<2x32xf32>
    %86 = arith.mulf %75, %48 : vector<2x32xf32>
    %87 = arith.mulf %67, %77 : vector<2x32xf32>
    %88 = arith.addf %86, %87 : vector<2x32xf32>
    %89 = math.tanh %88 : vector<2x32xf32>
    %90 = arith.mulf %85, %89 : vector<2x32xf32>
    %91 = arith.index_cast %c1_i32 : i32 to index
    %c0_43 = arith.constant 0 : index
    %c0_44 = arith.constant 0 : index
    %92 = vector.load %arg7[%91, %c0_43, %c0_44] : memref<8x2x32xf32, #tpu.memory_space<vmem>>, vector<1x2x32xf32>
    %93 = vector.shape_cast %92 : vector<1x2x32xf32> to vector<2x32xf32>
    %94 = vector.shape_cast %90 : vector<2x32xf32> to vector<1x2x32xf32>
    tpu.vector_store %arg7[%91, %c0_43, %c0_44], %94 {strides = array<i32>} : memref<8x2x32xf32, #tpu.memory_space<vmem>>, vector<1x2x32xf32>,
    %c2_i32 = arith.constant 2 : i32
    %95 = arith.index_cast %c2_i32 : i32 to index
    %c0_45 = arith.constant 0 : index
    %c0_46 = arith.constant 0 : index
    %96 = vector.load %arg10[%95, %c0_45, %c0_46] : memref<8x2x128xf32, #tpu.memory_space<vmem>>, vector<1x2x128xf32>
    %97 = vector.shape_cast %96 : vector<1x2x128xf32> to vector<2x128xf32>
    %cst_47 = arith.constant dense<0.000000e+00> : vector<2x128xf32>
    %98 = tpu.matmul %90, %12, %cst_47 {dimension_numbers = #tpu.dot_dimension_numbers<[1], [0], [0], [1], [0, 0, 1, 1], [], []>} : vector<2x32xf32>, vector<32x128xf32>, vector<2x128xf32> -> vector<2x128xf32>
    %99 = arith.addf %97, %98 : vector<2x128xf32>
    %100 = vector.extract_strided_slice %99 {offsets = [0, 0], sizes = [2, 32], strides = [1, 1]} : vector<2x128xf32> to vector<2x32xf32>
    %cst_48 = arith.constant 5.000000e-01 : f32
    %101 = vector.broadcast %cst_48 : f32 to vector<2x32xf32>
    %102 = arith.mulf %101, %100 : vector<2x32xf32>
    %103 = math.tanh %102 : vector<2x32xf32>
    %cst_49 = arith.constant 5.000000e-01 : f32
    %104 = vector.broadcast %cst_49 : f32 to vector<2x32xf32>
    %105 = arith.mulf %104, %103 : vector<2x32xf32>
    %cst_50 = arith.constant 5.000000e-01 : f32
    %106 = vector.broadcast %cst_50 : f32 to vector<2x32xf32>
    %107 = arith.addf %105, %106 : vector<2x32xf32>
    %108 = vector.extract_strided_slice %99 {offsets = [0, 32], sizes = [2, 32], strides = [1, 1]} : vector<2x128xf32> to vector<2x32xf32>
    %cst_51 = arith.constant 5.000000e-01 : f32
    %109 = vector.broadcast %cst_51 : f32 to vector<2x32xf32>
    %110 = arith.mulf %109, %108 : vector<2x32xf32>
    %111 = math.tanh %110 : vector<2x32xf32>
    %cst_52 = arith.constant 5.000000e-01 : f32
    %112 = vector.broadcast %cst_52 : f32 to vector<2x32xf32>
    %113 = arith.mulf %112, %111 : vector<2x32xf32>
    %cst_53 = arith.constant 5.000000e-01 : f32
    %114 = vector.broadcast %cst_53 : f32 to vector<2x32xf32>
    %115 = arith.addf %113, %114 : vector<2x32xf32>
    %116 = vector.extract_strided_slice %99 {offsets = [0, 64], sizes = [2, 32], strides = [1, 1]} : vector<2x128xf32> to vector<2x32xf32>
    %117 = math.tanh %116 : vector<2x32xf32>
    %118 = vector.extract_strided_slice %99 {offsets = [0, 96], sizes = [2, 32], strides = [1, 1]} : vector<2x128xf32> to vector<2x32xf32>
    %cst_54 = arith.constant 5.000000e-01 : f32
    %119 = vector.broadcast %cst_54 : f32 to vector<2x32xf32>
    %120 = arith.mulf %119, %118 : vector<2x32xf32>
    %121 = math.tanh %120 : vector<2x32xf32>
    %cst_55 = arith.constant 5.000000e-01 : f32
    %122 = vector.broadcast %cst_55 : f32 to vector<2x32xf32>
    %123 = arith.mulf %122, %121 : vector<2x32xf32>
    %cst_56 = arith.constant 5.000000e-01 : f32
    %124 = vector.broadcast %cst_56 : f32 to vector<2x32xf32>
    %125 = arith.addf %123, %124 : vector<2x32xf32>
    %126 = arith.mulf %115, %88 : vector<2x32xf32>
    %127 = arith.mulf %107, %117 : vector<2x32xf32>
    %128 = arith.addf %126, %127 : vector<2x32xf32>
    %129 = math.tanh %128 : vector<2x32xf32>
    %130 = arith.mulf %125, %129 : vector<2x32xf32>
    %131 = arith.index_cast %c2_i32 : i32 to index
    %c0_57 = arith.constant 0 : index
    %c0_58 = arith.constant 0 : index
    %132 = vector.load %arg7[%131, %c0_57, %c0_58] : memref<8x2x32xf32, #tpu.memory_space<vmem>>, vector<1x2x32xf32>
    %133 = vector.shape_cast %132 : vector<1x2x32xf32> to vector<2x32xf32>
    %134 = vector.shape_cast %130 : vector<2x32xf32> to vector<1x2x32xf32>
    tpu.vector_store %arg7[%131, %c0_57, %c0_58], %134 {strides = array<i32>} : memref<8x2x32xf32, #tpu.memory_space<vmem>>, vector<1x2x32xf32>,
    %c3_i32 = arith.constant 3 : i32
    %135 = arith.index_cast %c3_i32 : i32 to index
    %c0_59 = arith.constant 0 : index
    %c0_60 = arith.constant 0 : index
    %136 = vector.load %arg10[%135, %c0_59, %c0_60] : memref<8x2x128xf32, #tpu.memory_space<vmem>>, vector<1x2x128xf32>
    %137 = vector.shape_cast %136 : vector<1x2x128xf32> to vector<2x128xf32>
    %cst_61 = arith.constant dense<0.000000e+00> : vector<2x128xf32>
    %138 = tpu.matmul %130, %12, %cst_61 {dimension_numbers = #tpu.dot_dimension_numbers<[1], [0], [0], [1], [0, 0, 1, 1], [], []>} : vector<2x32xf32>, vector<32x128xf32>, vector<2x128xf32> -> vector<2x128xf32>
    %139 = arith.addf %137, %138 : vector<2x128xf32>
    %140 = vector.extract_strided_slice %139 {offsets = [0, 0], sizes = [2, 32], strides = [1, 1]} : vector<2x128xf32> to vector<2x32xf32>
    %cst_62 = arith.constant 5.000000e-01 : f32
    %141 = vector.broadcast %cst_62 : f32 to vector<2x32xf32>
    %142 = arith.mulf %141, %140 : vector<2x32xf32>
    %143 = math.tanh %142 : vector<2x32xf32>
    %cst_63 = arith.constant 5.000000e-01 : f32
    %144 = vector.broadcast %cst_63 : f32 to vector<2x32xf32>
    %145 = arith.mulf %144, %143 : vector<2x32xf32>
    %cst_64 = arith.constant 5.000000e-01 : f32
    %146 = vector.broadcast %cst_64 : f32 to vector<2x32xf32>
    %147 = arith.addf %145, %146 : vector<2x32xf32>
    %148 = vector.extract_strided_slice %139 {offsets = [0, 32], sizes = [2, 32], strides = [1, 1]} : vector<2x128xf32> to vector<2x32xf32>
    %cst_65 = arith.constant 5.000000e-01 : f32
    %149 = vector.broadcast %cst_65 : f32 to vector<2x32xf32>
    %150 = arith.mulf %149, %148 : vector<2x32xf32>
    %151 = math.tanh %150 : vector<2x32xf32>
    %cst_66 = arith.constant 5.000000e-01 : f32
    %152 = vector.broadcast %cst_66 : f32 to vector<2x32xf32>
    %153 = arith.mulf %152, %151 : vector<2x32xf32>
    %cst_67 = arith.constant 5.000000e-01 : f32
    %154 = vector.broadcast %cst_67 : f32 to vector<2x32xf32>
    %155 = arith.addf %153, %154 : vector<2x32xf32>
    %156 = vector.extract_strided_slice %139 {offsets = [0, 64], sizes = [2, 32], strides = [1, 1]} : vector<2x128xf32> to vector<2x32xf32>
    %157 = math.tanh %156 : vector<2x32xf32>
    %158 = vector.extract_strided_slice %139 {offsets = [0, 96], sizes = [2, 32], strides = [1, 1]} : vector<2x128xf32> to vector<2x32xf32>
    %cst_68 = arith.constant 5.000000e-01 : f32
    %159 = vector.broadcast %cst_68 : f32 to vector<2x32xf32>
    %160 = arith.mulf %159, %158 : vector<2x32xf32>
    %161 = math.tanh %160 : vector<2x32xf32>
    %cst_69 = arith.constant 5.000000e-01 : f32
    %162 = vector.broadcast %cst_69 : f32 to vector<2x32xf32>
    %163 = arith.mulf %162, %161 : vector<2x32xf32>
    %cst_70 = arith.constant 5.000000e-01 : f32
    %164 = vector.broadcast %cst_70 : f32 to vector<2x32xf32>
    %165 = arith.addf %163, %164 : vector<2x32xf32>
    %166 = arith.mulf %155, %128 : vector<2x32xf32>
    %167 = arith.mulf %147, %157 : vector<2x32xf32>
    %168 = arith.addf %166, %167 : vector<2x32xf32>
    %169 = math.tanh %168 : vector<2x32xf32>
    %170 = arith.mulf %165, %169 : vector<2x32xf32>
    %171 = arith.index_cast %c3_i32 : i32 to index
    %c0_71 = arith.constant 0 : index
    %c0_72 = arith.constant 0 : index
    %172 = vector.load %arg7[%171, %c0_71, %c0_72] : memref<8x2x32xf32, #tpu.memory_space<vmem>>, vector<1x2x32xf32>
    %173 = vector.shape_cast %172 : vector<1x2x32xf32> to vector<2x32xf32>
    %174 = vector.shape_cast %170 : vector<2x32xf32> to vector<1x2x32xf32>
    tpu.vector_store %arg7[%171, %c0_71, %c0_72], %174 {strides = array<i32>} : memref<8x2x32xf32, #tpu.memory_space<vmem>>, vector<1x2x32xf32>,
    %c4_i32 = arith.constant 4 : i32
    %175 = arith.index_cast %c4_i32 : i32 to index
    %c0_73 = arith.constant 0 : index
    %c0_74 = arith.constant 0 : index
    %176 = vector.load %arg10[%175, %c0_73, %c0_74] : memref<8x2x128xf32, #tpu.memory_space<vmem>>, vector<1x2x128xf32>
    %177 = vector.shape_cast %176 : vector<1x2x128xf32> to vector<2x128xf32>
    %cst_75 = arith.constant dense<0.000000e+00> : vector<2x128xf32>
    %178 = tpu.matmul %170, %12, %cst_75 {dimension_numbers = #tpu.dot_dimension_numbers<[1], [0], [0], [1], [0, 0, 1, 1], [], []>} : vector<2x32xf32>, vector<32x128xf32>, vector<2x128xf32> -> vector<2x128xf32>
    %179 = arith.addf %177, %178 : vector<2x128xf32>
    %180 = vector.extract_strided_slice %179 {offsets = [0, 0], sizes = [2, 32], strides = [1, 1]} : vector<2x128xf32> to vector<2x32xf32>
    %cst_76 = arith.constant 5.000000e-01 : f32
    %181 = vector.broadcast %cst_76 : f32 to vector<2x32xf32>
    %182 = arith.mulf %181, %180 : vector<2x32xf32>
    %183 = math.tanh %182 : vector<2x32xf32>
    %cst_77 = arith.constant 5.000000e-01 : f32
    %184 = vector.broadcast %cst_77 : f32 to vector<2x32xf32>
    %185 = arith.mulf %184, %183 : vector<2x32xf32>
    %cst_78 = arith.constant 5.000000e-01 : f32
    %186 = vector.broadcast %cst_78 : f32 to vector<2x32xf32>
    %187 = arith.addf %185, %186 : vector<2x32xf32>
    %188 = vector.extract_strided_slice %179 {offsets = [0, 32], sizes = [2, 32], strides = [1, 1]} : vector<2x128xf32> to vector<2x32xf32>
    %cst_79 = arith.constant 5.000000e-01 : f32
    %189 = vector.broadcast %cst_79 : f32 to vector<2x32xf32>
    %190 = arith.mulf %189, %188 : vector<2x32xf32>
    %191 = math.tanh %190 : vector<2x32xf32>
    %cst_80 = arith.constant 5.000000e-01 : f32
    %192 = vector.broadcast %cst_80 : f32 to vector<2x32xf32>
    %193 = arith.mulf %192, %191 : vector<2x32xf32>
    %cst_81 = arith.constant 5.000000e-01 : f32
    %194 = vector.broadcast %cst_81 : f32 to vector<2x32xf32>
    %195 = arith.addf %193, %194 : vector<2x32xf32>
    %196 = vector.extract_strided_slice %179 {offsets = [0, 64], sizes = [2, 32], strides = [1, 1]} : vector<2x128xf32> to vector<2x32xf32>
    %197 = math.tanh %196 : vector<2x32xf32>
    %198 = vector.extract_strided_slice %179 {offsets = [0, 96], sizes = [2, 32], strides = [1, 1]} : vector<2x128xf32> to vector<2x32xf32>
    %cst_82 = arith.constant 5.000000e-01 : f32
    %199 = vector.broadcast %cst_82 : f32 to vector<2x32xf32>
    %200 = arith.mulf %199, %198 : vector<2x32xf32>
    %201 = math.tanh %200 : vector<2x32xf32>
    %cst_83 = arith.constant 5.000000e-01 : f32
    %202 = vector.broadcast %cst_83 : f32 to vector<2x32xf32>
    %203 = arith.mulf %202, %201 : vector<2x32xf32>
    %cst_84 = arith.constant 5.000000e-01 : f32
    %204 = vector.broadcast %cst_84 : f32 to vector<2x32xf32>
    %205 = arith.addf %203, %204 : vector<2x32xf32>
    %206 = arith.mulf %195, %168 : vector<2x32xf32>
    %207 = arith.mulf %187, %197 : vector<2x32xf32>
    %208 = arith.addf %206, %207 : vector<2x32xf32>
    %209 = math.tanh %208 : vector<2x32xf32>
    %210 = arith.mulf %205, %209 : vector<2x32xf32>
    %211 = arith.index_cast %c4_i32 : i32 to index
    %c0_85 = arith.constant 0 : index
    %c0_86 = arith.constant 0 : index
    %212 = vector.load %arg7[%211, %c0_85, %c0_86] : memref<8x2x32xf32, #tpu.memory_space<vmem>>, vector<1x2x32xf32>
    %213 = vector.shape_cast %212 : vector<1x2x32xf32> to vector<2x32xf32>
    %214 = vector.shape_cast %210 : vector<2x32xf32> to vector<1x2x32xf32>
    tpu.vector_store %arg7[%211, %c0_85, %c0_86], %214 {strides = array<i32>} : memref<8x2x32xf32, #tpu.memory_space<vmem>>, vector<1x2x32xf32>,
    %c5_i32 = arith.constant 5 : i32
    %215 = arith.index_cast %c5_i32 : i32 to index
    %c0_87 = arith.constant 0 : index
    %c0_88 = arith.constant 0 : index
    %216 = vector.load %arg10[%215, %c0_87, %c0_88] : memref<8x2x128xf32, #tpu.memory_space<vmem>>, vector<1x2x128xf32>
    %217 = vector.shape_cast %216 : vector<1x2x128xf32> to vector<2x128xf32>
    %cst_89 = arith.constant dense<0.000000e+00> : vector<2x128xf32>
    %218 = tpu.matmul %210, %12, %cst_89 {dimension_numbers = #tpu.dot_dimension_numbers<[1], [0], [0], [1], [0, 0, 1, 1], [], []>} : vector<2x32xf32>, vector<32x128xf32>, vector<2x128xf32> -> vector<2x128xf32>
    %219 = arith.addf %217, %218 : vector<2x128xf32>
    %220 = vector.extract_strided_slice %219 {offsets = [0, 0], sizes = [2, 32], strides = [1, 1]} : vector<2x128xf32> to vector<2x32xf32>
    %cst_90 = arith.constant 5.000000e-01 : f32
    %221 = vector.broadcast %cst_90 : f32 to vector<2x32xf32>
    %222 = arith.mulf %221, %220 : vector<2x32xf32>
    %223 = math.tanh %222 : vector<2x32xf32>
    %cst_91 = arith.constant 5.000000e-01 : f32
    %224 = vector.broadcast %cst_91 : f32 to vector<2x32xf32>
    %225 = arith.mulf %224, %223 : vector<2x32xf32>
    %cst_92 = arith.constant 5.000000e-01 : f32
    %226 = vector.broadcast %cst_92 : f32 to vector<2x32xf32>
    %227 = arith.addf %225, %226 : vector<2x32xf32>
    %228 = vector.extract_strided_slice %219 {offsets = [0, 32], sizes = [2, 32], strides = [1, 1]} : vector<2x128xf32> to vector<2x32xf32>
    %cst_93 = arith.constant 5.000000e-01 : f32
    %229 = vector.broadcast %cst_93 : f32 to vector<2x32xf32>
    %230 = arith.mulf %229, %228 : vector<2x32xf32>
    %231 = math.tanh %230 : vector<2x32xf32>
    %cst_94 = arith.constant 5.000000e-01 : f32
    %232 = vector.broadcast %cst_94 : f32 to vector<2x32xf32>
    %233 = arith.mulf %232, %231 : vector<2x32xf32>
    %cst_95 = arith.constant 5.000000e-01 : f32
    %234 = vector.broadcast %cst_95 : f32 to vector<2x32xf32>
    %235 = arith.addf %233, %234 : vector<2x32xf32>
    %236 = vector.extract_strided_slice %219 {offsets = [0, 64], sizes = [2, 32], strides = [1, 1]} : vector<2x128xf32> to vector<2x32xf32>
    %237 = math.tanh %236 : vector<2x32xf32>
    %238 = vector.extract_strided_slice %219 {offsets = [0, 96], sizes = [2, 32], strides = [1, 1]} : vector<2x128xf32> to vector<2x32xf32>
    %cst_96 = arith.constant 5.000000e-01 : f32
    %239 = vector.broadcast %cst_96 : f32 to vector<2x32xf32>
    %240 = arith.mulf %239, %238 : vector<2x32xf32>
    %241 = math.tanh %240 : vector<2x32xf32>
    %cst_97 = arith.constant 5.000000e-01 : f32
    %242 = vector.broadcast %cst_97 : f32 to vector<2x32xf32>
    %243 = arith.mulf %242, %241 : vector<2x32xf32>
    %cst_98 = arith.constant 5.000000e-01 : f32
    %244 = vector.broadcast %cst_98 : f32 to vector<2x32xf32>
    %245 = arith.addf %243, %244 : vector<2x32xf32>
    %246 = arith.mulf %235, %208 : vector<2x32xf32>
    %247 = arith.mulf %227, %237 : vector<2x32xf32>
    %248 = arith.addf %246, %247 : vector<2x32xf32>
    %249 = math.tanh %248 : vector<2x32xf32>
    %250 = arith.mulf %245, %249 : vector<2x32xf32>
    %251 = arith.index_cast %c5_i32 : i32 to index
    %c0_99 = arith.constant 0 : index
    %c0_100 = arith.constant 0 : index
    %252 = vector.load %arg7[%251, %c0_99, %c0_100] : memref<8x2x32xf32, #tpu.memory_space<vmem>>, vector<1x2x32xf32>
    %253 = vector.shape_cast %252 : vector<1x2x32xf32> to vector<2x32xf32>
    %254 = vector.shape_cast %250 : vector<2x32xf32> to vector<1x2x32xf32>
    tpu.vector_store %arg7[%251, %c0_99, %c0_100], %254 {strides = array<i32>} : memref<8x2x32xf32, #tpu.memory_space<vmem>>, vector<1x2x32xf32>,
    %c6_i32 = arith.constant 6 : i32
    %255 = arith.index_cast %c6_i32 : i32 to index
    %c0_101 = arith.constant 0 : index
    %c0_102 = arith.constant 0 : index
    %256 = vector.load %arg10[%255, %c0_101, %c0_102] : memref<8x2x128xf32, #tpu.memory_space<vmem>>, vector<1x2x128xf32>
    %257 = vector.shape_cast %256 : vector<1x2x128xf32> to vector<2x128xf32>
    %cst_103 = arith.constant dense<0.000000e+00> : vector<2x128xf32>
    %258 = tpu.matmul %250, %12, %cst_103 {dimension_numbers = #tpu.dot_dimension_numbers<[1], [0], [0], [1], [0, 0, 1, 1], [], []>} : vector<2x32xf32>, vector<32x128xf32>, vector<2x128xf32> -> vector<2x128xf32>
    %259 = arith.addf %257, %258 : vector<2x128xf32>
    %260 = vector.extract_strided_slice %259 {offsets = [0, 0], sizes = [2, 32], strides = [1, 1]} : vector<2x128xf32> to vector<2x32xf32>
    %cst_104 = arith.constant 5.000000e-01 : f32
    %261 = vector.broadcast %cst_104 : f32 to vector<2x32xf32>
    %262 = arith.mulf %261, %260 : vector<2x32xf32>
    %263 = math.tanh %262 : vector<2x32xf32>
    %cst_105 = arith.constant 5.000000e-01 : f32
    %264 = vector.broadcast %cst_105 : f32 to vector<2x32xf32>
    %265 = arith.mulf %264, %263 : vector<2x32xf32>
    %cst_106 = arith.constant 5.000000e-01 : f32
    %266 = vector.broadcast %cst_106 : f32 to vector<2x32xf32>
    %267 = arith.addf %265, %266 : vector<2x32xf32>
    %268 = vector.extract_strided_slice %259 {offsets = [0, 32], sizes = [2, 32], strides = [1, 1]} : vector<2x128xf32> to vector<2x32xf32>
    %cst_107 = arith.constant 5.000000e-01 : f32
    %269 = vector.broadcast %cst_107 : f32 to vector<2x32xf32>
    %270 = arith.mulf %269, %268 : vector<2x32xf32>
    %271 = math.tanh %270 : vector<2x32xf32>
    %cst_108 = arith.constant 5.000000e-01 : f32
    %272 = vector.broadcast %cst_108 : f32 to vector<2x32xf32>
    %273 = arith.mulf %272, %271 : vector<2x32xf32>
    %cst_109 = arith.constant 5.000000e-01 : f32
    %274 = vector.broadcast %cst_109 : f32 to vector<2x32xf32>
    %275 = arith.addf %273, %274 : vector<2x32xf32>
    %276 = vector.extract_strided_slice %259 {offsets = [0, 64], sizes = [2, 32], strides = [1, 1]} : vector<2x128xf32> to vector<2x32xf32>
    %277 = math.tanh %276 : vector<2x32xf32>
    %278 = vector.extract_strided_slice %259 {offsets = [0, 96], sizes = [2, 32], strides = [1, 1]} : vector<2x128xf32> to vector<2x32xf32>
    %cst_110 = arith.constant 5.000000e-01 : f32
    %279 = vector.broadcast %cst_110 : f32 to vector<2x32xf32>
    %280 = arith.mulf %279, %278 : vector<2x32xf32>
    %281 = math.tanh %280 : vector<2x32xf32>
    %cst_111 = arith.constant 5.000000e-01 : f32
    %282 = vector.broadcast %cst_111 : f32 to vector<2x32xf32>
    %283 = arith.mulf %282, %281 : vector<2x32xf32>
    %cst_112 = arith.constant 5.000000e-01 : f32
    %284 = vector.broadcast %cst_112 : f32 to vector<2x32xf32>
    %285 = arith.addf %283, %284 : vector<2x32xf32>
    %286 = arith.mulf %275, %248 : vector<2x32xf32>
    %287 = arith.mulf %267, %277 : vector<2x32xf32>
    %288 = arith.addf %286, %287 : vector<2x32xf32>
    %289 = math.tanh %288 : vector<2x32xf32>
    %290 = arith.mulf %285, %289 : vector<2x32xf32>
    %291 = arith.index_cast %c6_i32 : i32 to index
    %c0_113 = arith.constant 0 : index
    %c0_114 = arith.constant 0 : index
    %292 = vector.load %arg7[%291, %c0_113, %c0_114] : memref<8x2x32xf32, #tpu.memory_space<vmem>>, vector<1x2x32xf32>
    %293 = vector.shape_cast %292 : vector<1x2x32xf32> to vector<2x32xf32>
    %294 = vector.shape_cast %290 : vector<2x32xf32> to vector<1x2x32xf32>
    tpu.vector_store %arg7[%291, %c0_113, %c0_114], %294 {strides = array<i32>} : memref<8x2x32xf32, #tpu.memory_space<vmem>>, vector<1x2x32xf32>,
    %c7_i32 = arith.constant 7 : i32
    %295 = arith.index_cast %c7_i32 : i32 to index
    %c0_115 = arith.constant 0 : index
    %c0_116 = arith.constant 0 : index
    %296 = vector.load %arg10[%295, %c0_115, %c0_116] : memref<8x2x128xf32, #tpu.memory_space<vmem>>, vector<1x2x128xf32>
    %297 = vector.shape_cast %296 : vector<1x2x128xf32> to vector<2x128xf32>
    %cst_117 = arith.constant dense<0.000000e+00> : vector<2x128xf32>
    %298 = tpu.matmul %290, %12, %cst_117 {dimension_numbers = #tpu.dot_dimension_numbers<[1], [0], [0], [1], [0, 0, 1, 1], [], []>} : vector<2x32xf32>, vector<32x128xf32>, vector<2x128xf32> -> vector<2x128xf32>
    %299 = arith.addf %297, %298 : vector<2x128xf32>
    %300 = vector.extract_strided_slice %299 {offsets = [0, 0], sizes = [2, 32], strides = [1, 1]} : vector<2x128xf32> to vector<2x32xf32>
    %cst_118 = arith.constant 5.000000e-01 : f32
    %301 = vector.broadcast %cst_118 : f32 to vector<2x32xf32>
    %302 = arith.mulf %301, %300 : vector<2x32xf32>
    %303 = math.tanh %302 : vector<2x32xf32>
    %cst_119 = arith.constant 5.000000e-01 : f32
    %304 = vector.broadcast %cst_119 : f32 to vector<2x32xf32>
    %305 = arith.mulf %304, %303 : vector<2x32xf32>
    %cst_120 = arith.constant 5.000000e-01 : f32
    %306 = vector.broadcast %cst_120 : f32 to vector<2x32xf32>
    %307 = arith.addf %305, %306 : vector<2x32xf32>
    %308 = vector.extract_strided_slice %299 {offsets = [0, 32], sizes = [2, 32], strides = [1, 1]} : vector<2x128xf32> to vector<2x32xf32>
    %cst_121 = arith.constant 5.000000e-01 : f32
    %309 = vector.broadcast %cst_121 : f32 to vector<2x32xf32>
    %310 = arith.mulf %309, %308 : vector<2x32xf32>
    %311 = math.tanh %310 : vector<2x32xf32>
    %cst_122 = arith.constant 5.000000e-01 : f32
    %312 = vector.broadcast %cst_122 : f32 to vector<2x32xf32>
    %313 = arith.mulf %312, %311 : vector<2x32xf32>
    %cst_123 = arith.constant 5.000000e-01 : f32
    %314 = vector.broadcast %cst_123 : f32 to vector<2x32xf32>
    %315 = arith.addf %313, %314 : vector<2x32xf32>
    %316 = vector.extract_strided_slice %299 {offsets = [0, 64], sizes = [2, 32], strides = [1, 1]} : vector<2x128xf32> to vector<2x32xf32>
    %317 = math.tanh %316 : vector<2x32xf32>
    %318 = vector.extract_strided_slice %299 {offsets = [0, 96], sizes = [2, 32], strides = [1, 1]} : vector<2x128xf32> to vector<2x32xf32>
    %cst_124 = arith.constant 5.000000e-01 : f32
    %319 = vector.broadcast %cst_124 : f32 to vector<2x32xf32>
    %320 = arith.mulf %319, %318 : vector<2x32xf32>
    %321 = math.tanh %320 : vector<2x32xf32>
    %cst_125 = arith.constant 5.000000e-01 : f32
    %322 = vector.broadcast %cst_125 : f32 to vector<2x32xf32>
    %323 = arith.mulf %322, %321 : vector<2x32xf32>
    %cst_126 = arith.constant 5.000000e-01 : f32
    %324 = vector.broadcast %cst_126 : f32 to vector<2x32xf32>
    %325 = arith.addf %323, %324 : vector<2x32xf32>
    %326 = arith.mulf %315, %288 : vector<2x32xf32>
    %327 = arith.mulf %307, %317 : vector<2x32xf32>
    %328 = arith.addf %326, %327 : vector<2x32xf32>
    %329 = math.tanh %328 : vector<2x32xf32>
    %330 = arith.mulf %325, %329 : vector<2x32xf32>
    %331 = arith.index_cast %c7_i32 : i32 to index
    %c0_127 = arith.constant 0 : index
    %c0_128 = arith.constant 0 : index
    %332 = vector.load %arg7[%331, %c0_127, %c0_128] : memref<8x2x32xf32, #tpu.memory_space<vmem>>, vector<1x2x32xf32>
    %333 = vector.shape_cast %332 : vector<1x2x32xf32> to vector<2x32xf32>
    %334 = vector.shape_cast %330 : vector<2x32xf32> to vector<1x2x32xf32>
    tpu.vector_store %arg7[%331, %c0_127, %c0_128], %334 {strides = array<i32>} : memref<8x2x32xf32, #tpu.memory_space<vmem>>, vector<1x2x32xf32>,
    %c8_i32 = arith.constant 8 : i32
    %c0_129 = arith.constant 0 : index
    %c0_130 = arith.constant 0 : index
    %335 = vector.load %arg11[%c0_129, %c0_130] : memref<2x32xf32, #tpu.memory_space<vmem>>, vector<2x32xf32>
    tpu.vector_store %arg11[%c0_129, %c0_130], %330 {strides = array<i32>} : memref<2x32xf32, #tpu.memory_space<vmem>>, vector<2x32xf32>,
    %c0_131 = arith.constant 0 : index
    %c0_132 = arith.constant 0 : index
    %336 = vector.load %arg12[%c0_131, %c0_132] : memref<2x32xf32, #tpu.memory_space<vmem>>, vector<2x32xf32>
    tpu.vector_store %arg12[%c0_131, %c0_132], %328 {strides = array<i32>} : memref<2x32xf32, #tpu.memory_space<vmem>>, vector<2x32xf32>,
    %c0_133 = arith.constant 0 : index
    %c0_134 = arith.constant 0 : index
    %337 = vector.load %arg8[%c0_133, %c0_134] : memref<2x32xf32, #tpu.memory_space<vmem>>, vector<2x32xf32>
    tpu.vector_store %arg8[%c0_133, %c0_134], %330 {strides = array<i32>} : memref<2x32xf32, #tpu.memory_space<vmem>>, vector<2x32xf32>,
    %c0_135 = arith.constant 0 : index
    %c0_136 = arith.constant 0 : index
    %338 = vector.load %arg9[%c0_135, %c0_136] : memref<2x32xf32, #tpu.memory_space<vmem>>, vector<2x32xf32>
    tpu.vector_store %arg9[%c0_135, %c0_136], %328 {strides = array<i32>} : memref<2x32xf32, #tpu.memory_space<vmem>>, vector<2x32xf32>,
    return
  }
  func.func @transform_0(%arg0: i32) -> (i32, i32, i32) {
    %c0_i32 = arith.constant 0 : i32
    %c0_i32_0 = arith.constant 0 : i32
    %c0_i32_1 = arith.constant 0 : i32
    return %arg0, %c0_i32, %c0_i32_0 : i32, i32, i32
  }
  func.func @transform_1(%arg0: i32) -> (i32, i32) {
    %c0_i32 = arith.constant 0 : i32
    %c0_i32_0 = arith.constant 0 : i32
    %c0_i32_1 = arith.constant 0 : i32
    return %c0_i32, %c0_i32_0 : i32, i32
  }
  func.func @transform_2(%arg0: i32) -> (i32, i32) {
    %c0_i32 = arith.constant 0 : i32
    %c0_i32_0 = arith.constant 0 : i32
    %c0_i32_1 = arith.constant 0 : i32
    return %c0_i32, %c0_i32_0 : i32, i32
  }
  func.func @transform_3(%arg0: i32) -> (i32, i32) {
    %c0_i32 = arith.constant 0 : i32
    %c0_i32_0 = arith.constant 0 : i32
    %c0_i32_1 = arith.constant 0 : i32
    return %c0_i32, %c0_i32_0 : i32, i32
  }
  func.func @transform_4(%arg0: i32) -> (i32, i32) {
    %c0_i32 = arith.constant 0 : i32
    %c0_i32_0 = arith.constant 0 : i32
    %c0_i32_1 = arith.constant 0 : i32
    return %c0_i32, %c0_i32_0 : i32, i32
  }
  func.func @transform_5(%arg0: i32) -> (i32, i32) {
    %c0_i32 = arith.constant 0 : i32
    %c0_i32_0 = arith.constant 0 : i32
    %c0_i32_1 = arith.constant 0 : i32
    return %c0_i32, %c0_i32_0 : i32, i32
  }
  func.func @transform_6(%arg0: i32) -> (i32, i32, i32) {
    %c0_i32 = arith.constant 0 : i32
    %c0_i32_0 = arith.constant 0 : i32
    %c0_i32_1 = arith.constant 0 : i32
    return %arg0, %c0_i32, %c0_i32_0 : i32, i32, i32
  }
  func.func @transform_7(%arg0: i32) -> (i32, i32) {
    %c0_i32 = arith.constant 0 : i32
    %c0_i32_0 = arith.constant 0 : i32
    %c0_i32_1 = arith.constant 0 : i32
    return %c0_i32, %c0_i32_0 : i32, i32
  }
  func.func @transform_8(%arg0: i32) -> (i32, i32) {
    %c0_i32 = arith.constant 0 : i32
    %c0_i32_0 = arith.constant 0 : i32
    %c0_i32_1 = arith.constant 0 : i32
    return %c0_i32, %c0_i32_0 : i32, i32
  }
}

</mosaic_0001>

<bundles_post_ra>
// kernel: tpu_custom_call.1
= control target key start
LH: loop header
LB: loop body
LE: loop exit
PB: predicated region body
PF: predicated region fallthrough
CT: control target
= control target key end

     0   :  { %14 = vsyncpa [#allocation6], 0  ;;  %s1085_s0 = inlined_call_operand.hbm [shape: f32[8,2,32], index: 0, kind: input, shape index: {}]   ;;  %s1086_s1 = inlined_call_operand.hbm [shape: f32[32,128], index: 1, kind: input, shape index: {}]   ;;  %s1087_s2 = inlined_call_operand.hbm [shape: f32[32,128], index: 2, kind: input, shape index: {}]   ;;  %s1088_s3 = inlined_call_operand.hbm [shape: f32[1,128], index: 3, kind: input, shape index: {}]   ;;  %s1089_s4 = inlined_call_operand.vmem [shape: f32[2,32], index: 4, kind: input, shape index: {}]   ;;  %s1090_s5 = inlined_call_operand.vmem [shape: f32[2,32], index: 5, kind: input, shape index: {}]   ;;  %s1091_s6 = inlined_call_operand.hbm [shape: f32[8,2,32], index: 6, kind: output, shape index: {0}]   ;;  %s1092_s7 = inlined_call_operand.hbm [shape: f32[2,32], index: 7, kind: output, shape index: {1}]   ;;  %s1093_s8 = inlined_call_operand.hbm [shape: f32[2,32], index: 8, kind: output, shape index: {2}]  }
   0x1   :  { %15 = vsyncpa [#allocation9], 0 }
   0x2   :  { %16 = vsyncpa [#allocation12], 0 }
   0x3   :  { %17 = vsyncpa [#allocation7], 0  ;;  %s36_s29 = sshll.u32 %s1086_s1, 4  ;;  %s37_s29 = int_to_ptr.hbm [resolvable:$true] %s36_s29 }
   0x4   :  { %18 = vsyncpa [#allocation15], 0  ;;  %s933_s30 = smov [#allocation8]   ;;  %s23_s12 = sshll.u32 %s1085_s0, 4  ;;  %s24_s12 = int_to_ptr.hbm [resolvable:$true] %s23_s12 }
   0x5   :  { %s38_s9 = sshll.u32 %s933_s30, 4  ;;  %s934_s13 = smov 128   ;;  %s39_s9 = int_to_ptr.vmem [resolvable:$true] %s38_s9 }
   0x6   :  { %s935_s14 = smov 8   ;;  %s936_s15 = smov [#allocation5]  }
   0x7   :  { %44 = dma.hbm_to_vmem [thread:$0]  %s37_s29, 512, %s39_s9, [#allocation9], %s934_s13, %s934_s13, %s935_s14  }
   0x8   :  { %s25_s16 = sshll.u32 %s936_s15, 4  ;;  %s937_s17 = smov 32   ;;  %s26_s16 = int_to_ptr.vmem [resolvable:$true] %s25_s16 }
   0x9   :  { %s938_s18 = smov 2   ;;  %s49_s20 = sshll.u32 %s1087_s2, 4  ;;  %s50_s20 = int_to_ptr.hbm [resolvable:$true] %s49_s20 }
   0xa   :  { %31 = dma.hbm_to_vmem [thread:$0]  %s24_s12, 256, %s26_s16, [#allocation6], %s937_s17, %s937_s17, %s938_s18  }
   0xb   :  { %s939_s21 = smov [#allocation10]   ;;  %s63_s24 = sshll.u32 %s1088_s3, 4  ;;  %s64_s24 = int_to_ptr.hbm [resolvable:$true] %s63_s24 }
   0xc   :  { %s51_s0 = sshll.u32 %s939_s21, 4  ;;  %s940_s25 = smov [#allocation11]   ;;  %s52_s0 = int_to_ptr.vmem [resolvable:$true] %s51_s0 }
   0xd   :  { %57 = dma.hbm_to_vmem [thread:$0]  %s50_s20, 512, %s52_s0, [#allocation9], %s934_s13, %s934_s13, %s935_s14  }
   0xe   :  { %s65_s26 = sshll.u32 %s940_s25, 4  ;;  %s66_s26 = int_to_ptr.vmem [resolvable:$true] %s65_s26 }
   0xf   :  { %68 = dma.hbm_to_vmem [thread:$0]  %s64_s24, 16, %s66_s26, [#allocation12]  }
  0x10   :  { %923 = dma.done.wait [#allocation6], 256  }
  0x11   :  { %924 = vsyncadd [#allocation6], 4294967040 }
  0x12   :  { %925 = dma.done.wait [#allocation9], 1024  }
  0x13   :  { %926 = vsyncadd [#allocation9], 4294966272 }
  0x14   :  { %927 = dma.done.wait [#allocation12], 16  }
  0x15   :  { %928 = vsyncadd [#allocation12], 4294967280  ;;  %v109_v0 = vld [vmem:[#allocation8 + $0x18] sm:$0xff]  ;;  %v108_v1 = vld [vmem:[#allocation8 + $0x10] sm:$0xff]  ;;  %vm94_vm0 = vcmask 254976   ;;  %vm139_vm1 = vcmask 261120  }
  0x16   :  { %156 = vmatpush.msra.mxu0 %v109_v0  ;;  %v107_v2 = vld [vmem:[#allocation8 + $0x8] sm:$0xff]  ;;  %v98_v3 = vld [vmem:[#allocation5] sm:$0x3]  ;;  %v99_v4 = vld [vmem:[#allocation5 + $0x2] sm:$0x3]  ;;  %s942_s28 = smov 96  }
  0x17   :  { %v100_v5 = vld [vmem:[#allocation5 + $0x4] sm:$0x3]  ;;  %v101_v6 = vld [vmem:[#allocation5 + $0x6] sm:$0x3]  ;;  %122 = vst [vmem:[#allocation1] ss:$4 sm:$0xff] %v98_v3 }
  0x18   :  { %157 = vmatpush.msra.mxu0 %v108_v1  ;;  %124 = vst [vmem:[#allocation1 + $0x1] ss:$4 sm:$0xff] %v99_v4  ;;  %v192_v7 = vld [vmem:[#allocation10 + $0x18] sm:$0xff]  ;;  %v191_v8 = vld [vmem:[#allocation10 + $0x10] sm:$0xff]  ;;  %v106_v9 = vld [vmem:[#allocation8] sm:$0xff]  ;;  %s943_s29 = smov [#allocation13]  }
  0x19   :  { %126 = vst [vmem:[#allocation1 + $0x2] ss:$4 sm:$0xff] %v100_v5  ;;  %211 = vmatpush.msra.mxu1 %v192_v7  ;;  %v93_v10 = vld [vmem:[%s1089_s4] sm:$0x3]  ;;  %268 = vmatpush.msra.mxu2 %v192_v7  ;;  %v190_v11 = vld [vmem:[#allocation10 + $0x8] sm:$0xff]  ;;  %v189_v12 = vld [vmem:[#allocation10] sm:$0xff] }
  0x1a   :  { %158 = vmatpush.msra.mxu0 %v107_v2  ;;  %128 = vst [vmem:[#allocation1 + $0x3] ss:$4 sm:$0xff] %v101_v6  ;;  %321 = vmatpush.msra.mxu3 %v192_v7  ;;  %v96_v15 = vld [vmem:[%s1090_s5] sm:$0x3]  ;;  %v1016_v16 = vld [vmem:[#allocation11] ss:$0 sm:$0xff] }
  0x1b   :  { %212 = vmatpush.msra.mxu1 %v191_v8  ;;  %95 = vst.msk [vmem:[#allocation3] sm:$0x3] %vm94_vm0, %v93_v10  ;;  %269 = vmatpush.msra.mxu2 %v191_v8  ;;  %s941_s5 = smov 64   ;;  %s635_s30 = sshll.u32 %s943_s29, 4  ;;  %s636_s30 = int_to_ptr.vmem [resolvable:$true] %s635_s30 }
  0x1c   :  { %159 = vmatpush.msra.mxu0 %v106_v9  ;;  %322 = vmatpush.msra.mxu3 %v191_v8  ;;  %97 = vst.msk [vmem:[#allocation4] sm:$0x3] %vm94_vm0, %v96_v15  ;;  %s637_s11 = sshll.u32 %s1091_s6, 4  ;;  %s944_s12 = smov [#allocation14]   ;;  %s638_s11 = int_to_ptr.hbm [resolvable:$true] %s637_s11 }
  0x1d   :  { %213 = vmatpush.msra.mxu1 %v190_v11  ;;  %270 = vmatpush.msra.mxu2 %v190_v11  ;;  %s649_s13 = sshll.u32 %s944_s12, 4  ;;  %s651_s16 = sshll.u32 %s1092_s7, 4  ;;  %s650_s13 = int_to_ptr.vmem [resolvable:$true] %s649_s13  ;;  %s652_s16 = int_to_ptr.hbm [resolvable:$true] %s651_s16 }
  0x1e   :  { %323 = vmatpush.msra.mxu3 %v190_v11  ;;  %533 = vmatpush.msrb.mxu0 %v192_v7  ;;  %s945_s1 = smov [#allocation16]   ;;  %s662_s0 = sshll.u32 %s1093_s8, 4  ;;  %s663_s0 = int_to_ptr.hbm [resolvable:$true] %s662_s0 }
  0x1f   :  { %214 = vmatpush.msra.mxu1 %v189_v12  ;;  %271 = vmatpush.msra.mxu2 %v189_v12  ;;  %s660_s19 = sshll.u32 %s945_s1, 4  ;;  %s661_s19 = int_to_ptr.vmem [resolvable:$true] %s660_s19 }
  0x20   :  { %324 = vmatpush.msra.mxu3 %v189_v12  ;;  %534 = vmatpush.msrb.mxu0 %v191_v8 }
  0x21   :  { %374 = vmatpush.msrb.mxu1 %v192_v7  ;;  %v137_v13 = vld.sshfl [vmem:[#allocation1] sm:$0xff pattern:$0x73625140]  ;;  %427 = vmatpush.msrb.mxu2 %v192_v7 }
  0x22   :  { %480 = vmatpush.msrb.mxu3 %v192_v7  ;;  %683 = vmatmul.msk.f32.vlgmr.msra.gmra.mxu0 %vm139_vm1, %v137_v13  ;;  %v193_v14 = vld [vmem:[#allocation3] sm:$0x3] }
  0x23   :  { %375 = vmatpush.msrb.mxu1 %v191_v8  ;;  %428 = vmatpush.msrb.mxu2 %v191_v8  ;;  %v194_v26 = vld [vmem:[#allocation4] sm:$0x3] }
  0x24   :  { %685 = vmatmul.msk.f32.vlgmr.msra.gmra.mxu1 %vm139_vm1, %v193_v14  ;;  %481 = vmatpush.msrb.mxu3 %v191_v8 }
  0x25   :  { %376 = vmatpush.msrb.mxu1 %v190_v11  ;;  %429 = vmatpush.msrb.mxu2 %v190_v11 }
  0x26   :  { %482 = vmatpush.msrb.mxu3 %v190_v11  ;;  %535 = vmatpush.msrb.mxu0 %v190_v11 }
  0x27   :  { %377 = vmatpush.msrb.mxu1 %v189_v12  ;;  %430 = vmatpush.msrb.mxu2 %v189_v12 }
  0x28   :  { %483 = vmatpush.msrb.mxu3 %v189_v12  ;;  %536 = vmatpush.msrb.mxu0 %v189_v12 }
  0x29   :  { %586 = vmatpush.msra.mxu1 %v192_v7 }
  0x2b   :  { %587 = vmatpush.msra.mxu1 %v191_v8 }
  0x2d   :  { %588 = vmatpush.msra.mxu1 %v190_v11 }
  0x2f   :  { %589 = vmatpush.msra.mxu1 %v189_v12 }
  0x9f   :  { %v161_v17 = vpop.f32.mrf.mxu0 }
  0xa0   :  { %v162_v18 = vadd.f32 %v1016_v16, %v161_v17 }
  0xa1   :  { %v216_v22 = vpop.f32.mrf.mxu1 }
  0xa2   :  { %v169_v19 = vrot.slane %v162_v18, 2  ;;  %v170_v20 = vrot.slane %v162_v18, 4  ;;  %v171_v21 = vrot.slane %v162_v18, 6  ;;  %181 = vst [vmem:[#allocation2] sm:$0x3] %v162_v18 }
  0xa4   :  { %182 = vst [vmem:[#allocation2 + $0x2] sm:$0x3] %v169_v19 }
  0xa5   :  { %183 = vst [vmem:[#allocation2 + $0x4] sm:$0x3] %v170_v20 }
  0xa6   :  { %184 = vst [vmem:[#allocation2 + $0x6] sm:$0x3] %v171_v21 }
  0xa9   :  { %v195_v23 = vld [vmem:[#allocation2] sm:$0x3] }
  0xaa   :  { %v219_v24 = vadd.f32 %v216_v22, %v195_v23 }
  0xab   :  { %v253_v41 = vld [vmem:[#allocation2 + $0x2] sm:$0x3] }
  0xac   :  { %707 = vtanh.f32 %v219_v24  ;;  %v220_v27 = vmul.f32 0.5, %v219_v24  ;;  %v306_v58 = vld [vmem:[#allocation2 + $0x4] sm:$0x3] }
  0xad   :  { %v359_v11 = vld [vmem:[#allocation2 + $0x6] sm:$0x3] }
  0xae   :  { %709 = vtanh.f32 %v220_v27  ;;  %v103_v27 = vld [vmem:[#allocation5 + $0xa] sm:$0x3] }
  0xaf   :  { %132 = vst [vmem:[#allocation1 + $0x21] ss:$4 sm:$0xff] %v103_v27 }
  0xb2   :  { %v708_v25 = vpop.eup %707 }
  0xb3   :  { %231 = vrot.lane.b32.xlu0 %v708_v25, %s941_s5 }
  0xb4   :  { %v710_v28 = vpop.eup %709 }
  0xb5   :  { %v222_v29 = vmul.f32 0.5, %v710_v28  ;;  %v104_v28 = vld [vmem:[#allocation5 + $0xc] sm:$0x3] }
  0xb6   :  { %134 = vst [vmem:[#allocation1 + $0x22] ss:$4 sm:$0xff] %v104_v28 }
  0xb7   :  { %v223_v30 = vadd.f32 0.5, %v222_v29  ;;  %v105_v29 = vld [vmem:[#allocation5 + $0xe] sm:$0x3] }
  0xb8   :  { %136 = vst [vmem:[#allocation1 + $0x23] ss:$4 sm:$0xff] %v105_v29 }
  0xbb   :  { %226 = vrot.lane.b32.xlu0 %v194_v26, %s937_s17  ;;  %v102_v26 = vld [vmem:[#allocation5 + $0x8] sm:$0x3] }
  0xbc   :  { %130 = vst [vmem:[#allocation1 + $0x20] ss:$4 sm:$0xff] %v102_v26 }
 0x125   :  { %v232_v31 = vpop.permute.xlu0 %231 }
 0x126   :  { %v234_v32 = vmul.f32 %v232_v31, %v223_v30 }
 0x128   :  { %236 = vrot.lane.b32.xlu1 %v234_v32, %s937_s17 }
 0x12d   :  { %v227_v33 = vpop.permute.xlu0 %226 }
 0x12e   :  { %v229_v34 = vmul.f32 %v227_v33, %v223_v30 }
 0x19a   :  { %v237_v35 = vpop.permute.xlu1 %236 }
 0x19b   :  { %v239_v36 = vadd.f32 %v237_v35, %v229_v34 }
 0x19d   :  { %711 = vtanh.f32 %v239_v36 }
 0x1a3   :  { %v712_v37 = vpop.eup %711 }
 0x1a4   :  { %242 = vrot.lane.b32.xlu1 %v712_v37, %s941_s5 }
 0x216   :  { %v243_v38 = vpop.permute.xlu1 %242 }
 0x217   :  { %v245_v39 = vmul.f32 %v243_v38, %v223_v30  ;;  %v138_v30 = vld.sshfl [vmem:[#allocation1 + $0x20] sm:$0xff pattern:$0x73625140] }
 0x218   :  { %684 = vmatmul.msk.f32.gmra.mxu0 %vm139_vm1, %v138_v30 }
 0x219   :  { %247 = vrot.lane.b32.xlu2 %v245_v39, %s937_s17 }
 0x273   :  { %v248_v40 = vpop.permute.xlu2 %247 }
 0x274   :  { %251 = vst.msk [vmem:[#allocation13] sm:$0x3] %vm94_vm0, %v248_v40  ;;  %686 = vmatmul.msk.f32.vlgmr.msra.gmra.mxu2 %vm139_vm1, %v248_v40 }
 0x295   :  { %v164_v33 = vpop.f32.mrf.mxu0 }
 0x296   :  { %v165_v34 = vadd.f32 %v1016_v16, %v164_v33 }
 0x298   :  { %v172_v35 = vrot.slane %v165_v34, 2  ;;  %v174_v37 = vrot.slane %v165_v34, 6  ;;  %185 = vst [vmem:[#allocation2 + $0x8] sm:$0x3] %v165_v34 }
 0x29a   :  { %186 = vst [vmem:[#allocation2 + $0xa] sm:$0x3] %v172_v35 }
 0x29b   :  { %188 = vst [vmem:[#allocation2 + $0xe] sm:$0x3] %v174_v37 }
 0x29f   :  { %v412_v39 = vld [vmem:[#allocation2 + $0x8] sm:$0x3] }
 0x2a2   :  { %v571_v26 = vld [vmem:[#allocation2 + $0xe] sm:$0x3] }
 0x2f7   :  { %v273_v42 = vpop.f32.mrf.mxu2 }
 0x2f8   :  { %v276_v43 = vadd.f32 %v273_v42, %v253_v41 }
 0x2fa   :  { %713 = vtanh.f32 %v276_v43  ;;  %v277_v45 = vmul.f32 0.5, %v276_v43 }
 0x2fc   :  { %715 = vtanh.f32 %v277_v45 }
 0x300   :  { %v714_v44 = vpop.eup %713 }
 0x301   :  { %284 = vrot.lane.b32.xlu2 %v714_v44, %s941_s5 }
 0x302   :  { %v716_v46 = vpop.eup %715 }
 0x303   :  { %v279_v47 = vmul.f32 0.5, %v716_v46 }
 0x305   :  { %v280_v48 = vadd.f32 0.5, %v279_v47 }
 0x307   :  { %v282_v51 = vmul.f32 %v280_v48, %v239_v36  ;;  %v173_v36 = vrot.slane %v165_v34, 4 }
 0x309   :  { %187 = vst [vmem:[#allocation2 + $0xc] sm:$0x3] %v173_v36 }
 0x35b   :  { %v285_v49 = vpop.permute.xlu2 %284 }
 0x35c   :  { %v287_v50 = vmul.f32 %v285_v49, %v280_v48 }
 0x35e   :  { %289 = vrot.lane.b32.xlu0 %v287_v50, %s937_s17 }
 0x3d0   :  { %v290_v52 = vpop.permute.xlu0 %289 }
 0x3d1   :  { %v292_v53 = vadd.f32 %v290_v52, %v282_v51 }
 0x3d3   :  { %717 = vtanh.f32 %v292_v53 }
 0x3d9   :  { %v718_v54 = vpop.eup %717 }
 0x3da   :  { %295 = vrot.lane.b32.xlu1 %v718_v54, %s941_s5 }
 0x44c   :  { %v296_v55 = vpop.permute.xlu1 %295 }
 0x44d   :  { %v298_v56 = vmul.f32 %v296_v55, %v280_v48  ;;  %v465_v55 = vld [vmem:[#allocation2 + $0xa] sm:$0x3] }
 0x44f   :  { %300 = vrot.lane.b32.xlu2 %v298_v56, %s937_s17 }
 0x4a9   :  { %v301_v57 = vpop.permute.xlu2 %300 }
 0x4aa   :  { %304 = vst.msk [vmem:[#allocation13 + $0x2] sm:$0x3] %vm94_vm0, %v301_v57  ;;  %687 = vmatmul.msk.f32.vlgmr.msra.gmra.mxu3 %vm139_vm1, %v301_v57 }
 0x52d   :  { %v326_v59 = vpop.f32.mrf.mxu3 }
 0x52e   :  { %v329_v60 = vadd.f32 %v326_v59, %v306_v58 }
 0x530   :  { %719 = vtanh.f32 %v329_v60  ;;  %v330_v62 = vmul.f32 0.5, %v329_v60 }
 0x532   :  { %721 = vtanh.f32 %v330_v62 }
 0x536   :  { %v720_v61 = vpop.eup %719 }
 0x537   :  { %337 = vrot.lane.b32.xlu0 %v720_v61, %s941_s5 }
 0x538   :  { %v722_v63 = vpop.eup %721 }
 0x539   :  { %v332_v0 = vmul.f32 0.5, %v722_v63 }
 0x53b   :  { %v333_v1 = vadd.f32 0.5, %v332_v0 }
 0x53d   :  { %v335_v4 = vmul.f32 %v333_v1, %v292_v53 }
 0x5a9   :  { %v338_v2 = vpop.permute.xlu0 %337 }
 0x5aa   :  { %v340_v3 = vmul.f32 %v338_v2, %v333_v1 }
 0x5ac   :  { %342 = vrot.lane.b32.xlu1 %v340_v3, %s937_s17 }
 0x61e   :  { %v343_v5 = vpop.permute.xlu1 %342 }
 0x61f   :  { %v345_v6 = vadd.f32 %v343_v5, %v335_v4 }
 0x621   :  { %723 = vtanh.f32 %v345_v6 }
 0x627   :  { %v724_v7 = vpop.eup %723 }
 0x628   :  { %348 = vrot.lane.b32.xlu2 %v724_v7, %s941_s5 }
 0x682   :  { %v349_v8 = vpop.permute.xlu2 %348 }
 0x683   :  { %v351_v9 = vmul.f32 %v349_v8, %v333_v1  ;;  %v518_v8 = vld [vmem:[#allocation2 + $0xc] sm:$0x3] }
 0x685   :  { %353 = vrot.lane.b32.xlu0 %v351_v9, %s937_s17 }
 0x6f7   :  { %v354_v10 = vpop.permute.xlu0 %353 }
 0x6f8   :  { %357 = vst.msk [vmem:[#allocation13 + $0x4] sm:$0x3] %vm94_vm0, %v354_v10  ;;  %688 = vmatmul.msk.f32.vlgmr.msrb.gmra.mxu1 %vm139_vm1, %v354_v10 }
 0x775   :  { %v379_v12 = vpop.f32.mrf.mxu1 }
 0x776   :  { %v382_v13 = vadd.f32 %v379_v12, %v359_v11 }
 0x778   :  { %725 = vtanh.f32 %v382_v13  ;;  %v383_v15 = vmul.f32 0.5, %v382_v13 }
 0x77a   :  { %727 = vtanh.f32 %v383_v15 }
 0x77e   :  { %v726_v14 = vpop.eup %725 }
 0x77f   :  { %390 = vrot.lane.b32.xlu1 %v726_v14, %s941_s5 }
 0x780   :  { %v728_v17 = vpop.eup %727 }
 0x781   :  { %v385_v18 = vmul.f32 0.5, %v728_v17 }
 0x783   :  { %v386_v19 = vadd.f32 0.5, %v385_v18 }
 0x785   :  { %v388_v22 = vmul.f32 %v386_v19, %v345_v6 }
 0x7f1   :  { %v391_v20 = vpop.permute.xlu1 %390 }
 0x7f2   :  { %v393_v21 = vmul.f32 %v391_v20, %v386_v19 }
 0x7f4   :  { %395 = vrot.lane.b32.xlu2 %v393_v21, %s937_s17 }
 0x84e   :  { %v396_v23 = vpop.permute.xlu2 %395 }
 0x84f   :  { %v398_v24 = vadd.f32 %v396_v23, %v388_v22 }
 0x851   :  { %729 = vtanh.f32 %v398_v24 }
 0x857   :  { %v730_v25 = vpop.eup %729 }
 0x858   :  { %401 = vrot.lane.b32.xlu0 %v730_v25, %s941_s5 }
 0x8ca   :  { %v402_v31 = vpop.permute.xlu0 %401 }
 0x8cb   :  { %v404_v32 = vmul.f32 %v402_v31, %v386_v19 }
 0x8cd   :  { %406 = vrot.lane.b32.xlu1 %v404_v32, %s937_s17 }
 0x93f   :  { %v407_v38 = vpop.permute.xlu1 %406 }
 0x940   :  { %410 = vst.msk [vmem:[#allocation13 + $0x6] sm:$0x3] %vm94_vm0, %v407_v38  ;;  %689 = vmatmul.msk.f32.vlgmr.msrb.gmra.mxu2 %vm139_vm1, %v407_v38 }
 0x9c3   :  { %v432_v40 = vpop.f32.mrf.mxu2 }
 0x9c4   :  { %v435_v41 = vadd.f32 %v432_v40, %v412_v39 }
 0x9c6   :  { %731 = vtanh.f32 %v435_v41  ;;  %v436_v16 = vmul.f32 0.5, %v435_v41 }
 0x9c8   :  { %733 = vtanh.f32 %v436_v16 }
 0x9cc   :  { %v732_v42 = vpop.eup %731 }
 0x9cd   :  { %443 = vrot.lane.b32.xlu2 %v732_v42, %s941_s5 }
 0x9ce   :  { %v734_v43 = vpop.eup %733 }
 0x9cf   :  { %v438_v44 = vmul.f32 0.5, %v734_v43 }
 0x9d1   :  { %v439_v45 = vadd.f32 0.5, %v438_v44 }
 0x9d3   :  { %v441_v48 = vmul.f32 %v439_v45, %v398_v24 }
 0xa27   :  { %v444_v46 = vpop.permute.xlu2 %443 }
 0xa28   :  { %v446_v47 = vmul.f32 %v444_v46, %v439_v45 }
 0xa2a   :  { %448 = vrot.lane.b32.xlu0 %v446_v47, %s937_s17 }
 0xa9c   :  { %v449_v49 = vpop.permute.xlu0 %448 }
 0xa9d   :  { %v451_v50 = vadd.f32 %v449_v49, %v441_v48 }
 0xa9f   :  { %735 = vtanh.f32 %v451_v50 }
 0xaa5   :  { %v736_v51 = vpop.eup %735 }
 0xaa6   :  { %454 = vrot.lane.b32.xlu1 %v736_v51, %s941_s5 }
 0xb18   :  { %v455_v52 = vpop.permute.xlu1 %454 }
 0xb19   :  { %v457_v53 = vmul.f32 %v455_v52, %v439_v45 }
 0xb1b   :  { %459 = vrot.lane.b32.xlu2 %v457_v53, %s937_s17 }
 0xb75   :  { %v460_v54 = vpop.permute.xlu2 %459 }
 0xb76   :  { %463 = vst.msk [vmem:[#allocation13 + $0x8] sm:$0x3] %vm94_vm0, %v460_v54  ;;  %690 = vmatmul.msk.f32.vlgmr.msrb.gmra.mxu3 %vm139_vm1, %v460_v54 }
 0xbf9   :  { %v485_v56 = vpop.f32.mrf.mxu3 }
 0xbfa   :  { %v488_v57 = vadd.f32 %v485_v56, %v465_v55 }
 0xbfc   :  { %737 = vtanh.f32 %v488_v57  ;;  %v489_v59 = vmul.f32 0.5, %v488_v57 }
 0xbfe   :  { %739 = vtanh.f32 %v489_v59 }
 0xc02   :  { %v738_v58 = vpop.eup %737 }
 0xc03   :  { %496 = vrot.lane.b32.xlu0 %v738_v58, %s941_s5 }
 0xc04   :  { %v740_v60 = vpop.eup %739 }
 0xc05   :  { %v491_v61 = vmul.f32 0.5, %v740_v60 }
 0xc07   :  { %v492_v62 = vadd.f32 0.5, %v491_v61 }
 0xc09   :  { %v494_v1 = vmul.f32 %v492_v62, %v451_v50 }
 0xc75   :  { %v497_v63 = vpop.permute.xlu0 %496 }
 0xc76   :  { %v499_v0 = vmul.f32 %v497_v63, %v492_v62 }
 0xc78   :  { %501 = vrot.lane.b32.xlu1 %v499_v0, %s937_s17 }
 0xcea   :  { %v502_v2 = vpop.permute.xlu1 %501 }
 0xceb   :  { %v504_v3 = vadd.f32 %v502_v2, %v494_v1 }
 0xced   :  { %741 = vtanh.f32 %v504_v3 }
 0xcf3   :  { %v742_v4 = vpop.eup %741 }
 0xcf4   :  { %507 = vrot.lane.b32.xlu2 %v742_v4, %s941_s5 }
 0xd4e   :  { %v508_v5 = vpop.permute.xlu2 %507 }
 0xd4f   :  { %v510_v6 = vmul.f32 %v508_v5, %v492_v62 }
 0xd51   :  { %512 = vrot.lane.b32.xlu0 %v510_v6, %s937_s17 }
 0xdc3   :  { %v513_v7 = vpop.permute.xlu0 %512 }
 0xdc4   :  { %516 = vst.msk [vmem:[#allocation13 + $0xa] sm:$0x3] %vm94_vm0, %v513_v7  ;;  %691 = vmatmul.msk.f32.vlgmr.msrb.gmra.mxu0 %vm139_vm1, %v513_v7 }
 0xe41   :  { %v538_v9 = vpop.f32.mrf.mxu0 }
 0xe42   :  { %v541_v10 = vadd.f32 %v538_v9, %v518_v8 }
 0xe44   :  { %743 = vtanh.f32 %v541_v10  ;;  %v542_v12 = vmul.f32 0.5, %v541_v10 }
 0xe46   :  { %745 = vtanh.f32 %v542_v12 }
 0xe4a   :  { %v744_v11 = vpop.eup %743 }
 0xe4b   :  { %549 = vrot.lane.b32.xlu1 %v744_v11, %s941_s5 }
 0xe4c   :  { %v746_v13 = vpop.eup %745 }
 0xe4d   :  { %v544_v14 = vmul.f32 0.5, %v746_v13 }
 0xe4f   :  { %v545_v15 = vadd.f32 0.5, %v544_v14 }
 0xe51   :  { %v547_v19 = vmul.f32 %v545_v15, %v504_v3 }
 0xebd   :  { %v550_v17 = vpop.permute.xlu1 %549 }
 0xebe   :  { %v552_v18 = vmul.f32 %v550_v17, %v545_v15 }
 0xec0   :  { %554 = vrot.lane.b32.xlu2 %v552_v18, %s937_s17 }
 0xf1a   :  { %v555_v20 = vpop.permute.xlu2 %554 }
 0xf1b   :  { %v557_v21 = vadd.f32 %v555_v20, %v547_v19 }
 0xf1d   :  { %747 = vtanh.f32 %v557_v21 }
 0xf23   :  { %v748_v22 = vpop.eup %747 }
 0xf24   :  { %560 = vrot.lane.b32.xlu0 %v748_v22, %s941_s5 }
 0xf96   :  { %v561_v23 = vpop.permute.xlu0 %560 }
 0xf97   :  { %v563_v24 = vmul.f32 %v561_v23, %v545_v15 }
 0xf99   :  { %565 = vrot.lane.b32.xlu1 %v563_v24, %s937_s17 }
0x100b   :  { %v566_v25 = vpop.permute.xlu1 %565 }
0x100c   :  { %569 = vst.msk [vmem:[#allocation13 + $0xc] sm:$0x3] %vm94_vm0, %v566_v25  ;;  %692 = vmatmul.msk.f32.vlgmr.msra.gmra.mxu1 %vm139_vm1, %v566_v25 }
0x1089   :  { %v591_v27 = vpop.f32.mrf.mxu1 }
0x108a   :  { %v594_v28 = vadd.f32 %v591_v27, %v571_v26 }
0x108c   :  { %749 = vtanh.f32 %v594_v28  ;;  %v595_v30 = vmul.f32 0.5, %v594_v28 }
0x108e   :  { %751 = vtanh.f32 %v595_v30 }
0x1092   :  { %v750_v29 = vpop.eup %749 }
0x1093   :  { %602 = vrot.lane.b32.xlu2 %v750_v29, %s941_s5 }
0x1094   :  { %v752_v31 = vpop.eup %751 }
0x1095   :  { %v597_v32 = vmul.f32 0.5, %v752_v31 }
0x1097   :  { %v598_v33 = vadd.f32 0.5, %v597_v32 }
0x1099   :  { %v600_v36 = vmul.f32 %v598_v33, %v557_v21 }
0x10ed   :  { %v603_v34 = vpop.permute.xlu2 %602 }
0x10ee   :  { %v605_v35 = vmul.f32 %v603_v34, %v598_v33 }
0x10f0   :  { %607 = vrot.lane.b32.xlu0 %v605_v35, %s937_s17 }
0x1162   :  { %v608_v37 = vpop.permute.xlu0 %607 }
0x1163   :  { %v610_v38 = vadd.f32 %v608_v37, %v600_v36 }
0x1165   :  { %753 = vtanh.f32 %v610_v38  ;;  %625 = vrot.lane.b32.xlu0 %v610_v38, %s942_s28 }
0x116b   :  { %v754_v39 = vpop.eup %753 }
0x116c   :  { %613 = vrot.lane.b32.xlu1 %v754_v39, %s941_s5 }
0x11d7   :  { %v626_v40 = vpop.permute.xlu0 %625 }
0x11d8   :  { %628 = vst.msk [vmem:[#allocation4] sm:$0x3] %vm94_vm0, %v626_v40 }
0x11d9   :  { %630 = vst.msk [vmem:[#allocation16] sm:$0x3] %vm94_vm0, %v626_v40 }
0x11de   :  { %v614_v41 = vpop.permute.xlu1 %613 }
0x11df   :  { %v616_v42 = vmul.f32 %v614_v41, %v598_v33 }
0x11e1   :  { %618 = vrot.lane.b32.xlu2 %v616_v42, %s937_s17 }
0x123b   :  { %v619_v16 = vpop.permute.xlu2 %618 }
0x123c   :  { %622 = vst.msk [vmem:[#allocation13 + $0xe] sm:$0x3] %vm94_vm0, %v619_v16 }
0x123d   :  { %623 = vst.msk [vmem:[#allocation3] sm:$0x3] %vm94_vm0, %v619_v16  ;;  %643 = dma.vmem_to_hbm [thread:$0]  %s636_s30, 256, %s638_s11, [#allocation7], %s937_s17, %s937_s17, %s938_s18  }
0x123e   :  { %629 = vst.msk [vmem:[#allocation14] sm:$0x3] %vm94_vm0, %v619_v16 }
0x123f   :  { %654 = dma.vmem_to_hbm [thread:$0]  %s650_s13, 32, %s652_s16, [#allocation15]  }
0x1240   :  { %665 = dma.vmem_to_hbm [thread:$0]  %s661_s19, 32, %s663_s0, [#allocation15]  }
0x1241   :  { %929 = dma.done.wait [#allocation7], 256  }
0x1242   :  { %930 = vsyncadd [#allocation7], 4294967040 }
0x1243   :  { %931 = dma.done.wait [#allocation15], 64  }
0x1244   :  { %932 = vsyncadd [#allocation15], 4294967232 }
0x1245   :  { %678 = vsyncpa [#allocation6], 1 }
0x1246   :  { %679 = vsyncpa [#allocation9], 1 }
0x1247   :  { %680 = vsyncpa [#allocation12], 1 }
0x1248   :  { %681 = vsyncpa [#allocation7], 1 }
0x1249   :  { %682 = vsyncpa [#allocation15], 1 }

</bundles_post_ra>
